<compile_context>
chip_gen: v7x
topology: tpu7x:2x2x1
jax: 0.10.0
libtpu: 0.0.40
codegen_flags: <defaults>
</compile_context>

<pallas_src>
import jax
import jax.numpy as jnp
from jax import lax
from jax.experimental import pallas as pl
from jax.experimental.pallas import tpu as pltpu


def _round_up(x, m):
    return ((x + m - 1) // m) * m


# -----------------------------------------------------------------------------
# Kernel: one grid step == one chunk of C decode steps.
# -----------------------------------------------------------------------------
def fused_generator_kernel(
    gx_ref,        # (C, B_pad, 4*H_pad) f32 : precomputed x-gates (Emb @ W_ih^T + b)
    w_hh_t_ref,    # (H_pad, 4*H_pad)  weight dtype, VMEM-resident, gate blocks aligned
    w_lin_t_ref,   # (H_pad, O_pad)    weight dtype, VMEM-resident
    b_lin_ref,     # (B_pad, O_pad)    f32, padded lanes = -1e30
    h0_ref,        # (B_pad, H_pad)    f32
    c0_ref,        # (B_pad, H_pad)    f32
    logp_out_ref,  # (C, B_pad, O_pad) f32  per-chunk output block
    h_out_ref,     # (B_pad, H_pad)    f32  resident carry (recurrent state)
    c_out_ref,     # (B_pad, H_pad)    f32  resident carry
):
    chunk = pl.program_id(0)
    C = gx_ref.shape[0]
    H_pad = h_out_ref.shape[1]
    wd = w_hh_t_ref.dtype  # MXU operand dtype (bf16 or f32); accumulate in f32.

    # Initialize the recurrent state once (chunk 0 only).
    @pl.when(chunk == 0)
    def _init():
        h_out_ref[...] = h0_ref[...]
        c_out_ref[...] = c0_ref[...]

    def step(s, carry):
        h_prev, c_prev = carry

        # LSTM cell (PyTorch gate order i, f, g, o).  Only the recurrent
        # h_prev @ W_hh matmul is on the serial chain; the x-projection was
        # folded into gx outside the kernel.
        gates = gx_ref[s] + jnp.dot(
            h_prev.astype(wd), w_hh_t_ref[...], preferred_element_type=jnp.float32
        )  # (B_pad, 4*H_pad), each gate block 128-lane aligned -> free slices

        i_g = jax.nn.sigmoid(gates[:, 0 * H_pad:1 * H_pad])
        f_g = jax.nn.sigmoid(gates[:, 1 * H_pad:2 * H_pad])
        g_g = jnp.tanh(gates[:, 2 * H_pad:3 * H_pad])
        o_g = jax.nn.sigmoid(gates[:, 3 * H_pad:4 * H_pad])

        c_new = f_g * c_prev + i_g * g_g
        h_new = o_g * jnp.tanh(c_new)

        # Linear + LogSoftmax(dim=1).  Padded output lanes have a -1e30 bias ->
        # exp underflows to 0, so they never affect the row max / sum.
        logits = (
            jnp.dot(h_new.astype(wd), w_lin_t_ref[...],
                    preferred_element_type=jnp.float32)
            + b_lin_ref[...]
        )
        m = jnp.max(logits, axis=1, keepdims=True)
        shifted = logits - m
        lse = jnp.log(jnp.sum(jnp.exp(shifted), axis=1, keepdims=True))
        logp_out_ref[s] = shifted - lse

        return h_new, c_new

    h, c = lax.fori_loop(0, C, step, (h_out_ref[...], c_out_ref[...]), unroll=True)

    # Carry recurrent state (written back to HBM only once, at grid end).
    h_out_ref[...] = h
    c_out_ref[...] = c


# -----------------------------------------------------------------------------
# Parameter helpers
# -----------------------------------------------------------------------------
def make_generator_params(key, input_size, hidden_size, output_size):
    """Deterministic synthetic parameters (PyTorch-style shapes)."""
    ks = jax.random.split(key, 7)
    s = 1.0 / jnp.sqrt(hidden_size)
    return {
        "embedding": jax.random.normal(ks[0], (input_size, hidden_size), jnp.float32),
        "w_ih": jax.random.uniform(ks[1], (4 * hidden_size, hidden_size), jnp.float32, -s, s),
        "w_hh": jax.random.uniform(ks[2], (4 * hidden_size, hidden_size), jnp.float32, -s, s),
        "b_ih": jax.random.uniform(ks[3], (4 * hidden_size,), jnp.float32, -s, s),
        "b_hh": jax.random.uniform(ks[4], (4 * hidden_size,), jnp.float32, -s, s),
        "w_lin": jax.random.uniform(ks[5], (output_size, hidden_size), jnp.float32, -s, s),
        "b_lin": jax.random.uniform(ks[6], (output_size,), jnp.float32, -s, s),
    }


def _prepare_padded(params, batch, weight_dtype):
    """Pad / relayout parameters to lane-dense, gate-block-aligned shapes and
    fold Embedding -> W_ih (+ both LSTM biases) into one exact f32 table."""
    V, H = params["embedding"].shape
    O = params["w_lin"].shape[0]
    H_pad = _round_up(H, 128)
    O_pad = _round_up(O, 128)
    B_pad = _round_up(max(batch, 8), 8)

    # Folded x-projection table: G[v] = Emb[v] @ W_ih^T + b_ih + b_hh  (exact f32).
    g = (params["embedding"] @ params["w_ih"].T
         + params["b_ih"] + params["b_hh"])                      # (V, 4H)
    g_table = jnp.zeros((V, 4 * H_pad), jnp.float32)
    for k in range(4):
        g_table = g_table.at[:, k * H_pad:k * H_pad + H].set(g[:, k * H:(k + 1) * H])

    # Recurrent weight, transposed + gate-block aligned.
    w_hh_t = jnp.zeros((H_pad, 4 * H_pad), weight_dtype)
    for k in range(4):
        blk = params["w_hh"][k * H:(k + 1) * H, :].T.astype(weight_dtype)  # (H, H)
        w_hh_t = w_hh_t.at[:H, k * H_pad:k * H_pad + H].set(blk)

    # Output head.
    w_lin_t = jnp.zeros((H_pad, O_pad), weight_dtype)
    w_lin_t = w_lin_t.at[:H, :O].set(params["w_lin"].T.astype(weight_dtype))

    b_lin = jnp.full((O_pad,), -1e30, jnp.float32)
    b_lin = b_lin.at[:O].set(params["b_lin"])
    b_lin = jnp.broadcast_to(b_lin[None, :], (B_pad, O_pad))    # hoisted broadcast

    return {
        "g_table": g_table, "w_hh_t": w_hh_t, "w_lin_t": w_lin_t, "b_lin": b_lin,
        "H": H, "O": O, "H_pad": H_pad, "O_pad": O_pad, "B_pad": B_pad,
    }


def _pick_chunk(T, max_chunk=8):
    """Largest chunk size <= max_chunk that divides T (keeps h/c exact, no pad steps)."""
    for c in range(min(max_chunk, T), 0, -1):
        if T % c == 0:
            return c
    return 1


# -----------------------------------------------------------------------------
# Wrappers
# -----------------------------------------------------------------------------
def generator_decode(tokens, hidden, cell, params, weight_dtype=jnp.bfloat16,
                     max_chunk=8):
    """Fused multi-step decode.

    tokens: (T, B) int32 token ids (one externally supplied token per step)
    hidden, cell: (1, B, H) f32
    Returns (log_probs (T, B, O), hidden (1, B, H), cell (1, B, H)).
    """
    T, B = tokens.shape
    H = hidden.shape[-1]
    pp = _prepare_padded(params, B, weight_dtype)
    H_pad, O_pad, B_pad, O = pp["H_pad"], pp["O_pad"], pp["B_pad"], pp["O"]

    C = _pick_chunk(T, max_chunk)
    num_chunks = T // C

    # Token ids (padded batch rows -> token 0; their rows are sliced off later).
    tok_pad = jnp.zeros((T, B_pad), jnp.int32).at[:, :B].set(tokens.astype(jnp.int32))

    # Hoist the entire input projection out of the recurrence: one XLA gather.
    gates_x = jnp.take(pp["g_table"], tok_pad, axis=0)   # (T, B_pad, 4*H_pad) f32

    h0 = jnp.zeros((B_pad, H_pad), jnp.float32).at[:B, :H].set(hidden[0])
    c0 = jnp.zeros((B_pad, H_pad), jnp.float32).at[:B, :H].set(cell[0])

    _const2 = lambda t: (0, 0)

    grid_spec = pltpu.PrefetchScalarGridSpec(
        num_scalar_prefetch=0,
        grid=(num_chunks,),
        in_specs=[
            pl.BlockSpec((C, B_pad, 4 * H_pad), lambda t: (t, 0, 0)),  # gates_x chunk
            pl.BlockSpec((H_pad, 4 * H_pad), _const2),                 # w_hh_t (resident)
            pl.BlockSpec((H_pad, O_pad), _const2),                     # w_lin_t (resident)
            pl.BlockSpec((B_pad, O_pad), _const2),                     # b_lin (resident)
            pl.BlockSpec((B_pad, H_pad), _const2),                     # h0
            pl.BlockSpec((B_pad, H_pad), _const2),                     # c0
        ],
        out_specs=(
            pl.BlockSpec((C, B_pad, O_pad), lambda t: (t, 0, 0)),      # per-chunk logp
            pl.BlockSpec((B_pad, H_pad), _const2),                     # h (resident carry)
            pl.BlockSpec((B_pad, H_pad), _const2),                     # c (resident carry)
        ),
    )

    out_shape = (
        jax.ShapeDtypeStruct((T, B_pad, O_pad), jnp.float32),
        jax.ShapeDtypeStruct((B_pad, H_pad), jnp.float32),
        jax.ShapeDtypeStruct((B_pad, H_pad), jnp.float32),
    )

    logp_p, h_p, c_p = pl.pallas_call(
        fused_generator_kernel,
        grid_spec=grid_spec,
        out_shape=out_shape,
        compiler_params=pltpu.CompilerParams(
            dimension_semantics=("arbitrary",),      # recurrent: chunks are sequential
            vmem_limit_bytes=32 * 1024 * 1024,       # tiny footprint; safe on v7x too
        ),
    )(gates_x, pp["w_hh_t"], pp["w_lin_t"], pp["b_lin"], h0, c0)

    logp = logp_p[:, :B, :O]
    h_new = h_p[:B, :H][None, :, :]
    c_new = c_p[:B, :H][None, :, :]
    return logp, h_new, c_new


def generator_forward(x, hidden, cell, params, weight_dtype=jnp.bfloat16):
    """Exact module semantics: one decode step.

    x: (B,) int32; hidden/cell: (1, B, H) f32.
    Returns (log_probs (B, O), hidden (1, B, H), cell (1, B, H)).
    """
    tokens = x.reshape(-1)[None, :].astype(jnp.int32)
    logp, h_new, c_new = generator_decode(tokens, hidden, cell, params, weight_dtype)
    return logp[0], h_new, c_new


# -----------------------------------------------------------------------------
# Pure-JAX reference
# -----------------------------------------------------------------------------
def _reference_decode(tokens, hidden, cell, params):
    h, c = hidden[0], cell[0]
    H = h.shape[-1]
    outs = []
    for t in range(tokens.shape[0]):
        emb = params["embedding"][tokens[t]]
        gates = (emb @ params["w_ih"].T + h @ params["w_hh"].T
                 + params["b_ih"] + params["b_hh"])
        i = jax.nn.sigmoid(gates[:, 0 * H:1 * H])
        f = jax.nn.sigmoid(gates[:, 1 * H:2 * H])
        g = jnp.tanh(gates[:, 2 * H:3 * H])
        o = jax.nn.sigmoid(gates[:, 3 * H:4 * H])
        c = f * c + i * g
        h = o * jnp.tanh(c)
        logits = h @ params["w_lin"].T + params["b_lin"]
        outs.append(jax.nn.log_softmax(logits, axis=1))
    return jnp.stack(outs, 0), h[None], c[None]


if __name__ == "__main__":
    # Small shapes consistent with the module (LSTM generator decode).
    input_size = 16    # vocab
    hidden_size = 32
    output_size = 16
    batch_size = 4
    num_layers = 1     # module default; bidirectional=False
    num_steps = 6      # fused decode steps

    key = jax.random.PRNGKey(0)
    k_param, k_tok, k_h, k_c = jax.random.split(key, 4)

    params = make_generator_params(k_param, input_size, hidden_size, output_size)
    tokens = jax.random.randint(k_tok, (num_steps, batch_size), 0, input_size, dtype=jnp.int32)
    hidden = jax.random.normal(k_h, (num_layers, batch_size, hidden_size), jnp.float32)
    cell = jax.random.normal(k_c, (num_layers, batch_size, hidden_size), jnp.float32)

    # --- Fused multi-step decode (f32 weights, tight tolerance) ---------------
    logp, h_new, c_new = generator_decode(tokens, hidden, cell, params,
                                          weight_dtype=jnp.float32)
    jax.block_until_ready((logp, h_new, c_new))

    logp_r, h_r, c_r = _reference_decode(tokens, hidden, cell, params)
    assert logp.shape == (num_steps, batch_size, output_size)
    assert h_new.shape == (num_layers, batch_size, hidden_size)
    assert c_new.shape == (num_layers, batch_size, hidden_size)
    assert jnp.allclose(logp, logp_r, atol=1e-4), "fused log-softmax mismatch"
    assert jnp.allclose(h_new, h_r, atol=1e-4), "fused hidden state mismatch"
    assert jnp.allclose(c_new, c_r, atol=1e-4), "fused cell state mismatch"

    # --- Single-step path (exact module forward semantics, f32) ---------------
    logp1, h1, c1 = generator_forward(tokens[0], hidden, cell, params,
                                      weight_dtype=jnp.float32)
    jax.block_until_ready((logp1, h1, c1))
    logp1_r, h1_r, c1_r = _reference_decode(tokens[:1], hidden, cell, params)
    assert logp1.shape == (batch_size, output_size)
    assert jnp.allclose(logp1, logp1_r[0], atol=1e-4), "single-step logp mismatch"
    assert jnp.allclose(h1, h1_r, atol=1e-4), "single-step hidden mismatch"
    assert jnp.allclose(c1, c1_r, atol=1e-4), "single-step cell mismatch"

    # --- Default path: bf16 MXU weights, f32 activations / state / softmax ----
    logp_bf, h_bf, c_bf = generator_decode(tokens, hidden, cell, params)
    jax.block_until_ready((logp_bf, h_bf, c_bf))
    assert jnp.allclose(logp_bf, logp_r, atol=1e-1), "bf16-weight logp drifted too far"
    assert jnp.allclose(h_bf, h_r, atol=1e-1), "bf16-weight hidden drifted too far"
    assert jnp.allclose(c_bf, c_r, atol=1e-1), "bf16-weight cell drifted too far"

    print("KERNEL_OK")
</pallas_src>

<mosaic_0001>
module attributes {stable_mosaic.version = 11 : i64} {
  func.func @fused_generator_kernel(%arg0: i32, %arg1: memref<6x8x512xf32, #tpu.memory_space<vmem>>, %arg2: memref<128x512xf32, #tpu.memory_space<vmem>>, %arg3: memref<128x128xf32, #tpu.memory_space<vmem>>, %arg4: memref<8x128xf32, #tpu.memory_space<vmem>>, %arg5: memref<8x128xf32, #tpu.memory_space<vmem>>, %arg6: memref<8x128xf32, #tpu.memory_space<vmem>>, %arg7: memref<6x8x128xf32, #tpu.memory_space<vmem>>, %arg8: memref<8x128xf32, #tpu.memory_space<vmem>>, %arg9: memref<8x128xf32, #tpu.memory_space<vmem>>) attributes {dimension_semantics = [#tpu.dimension_semantics<arbitrary>], iteration_bounds = array<i64: 1>, scalar_prefetch = 0 : i64, scratch_operands = 0 : i64, tpu.core_type = #tpu.core_type<tc>, window_params = [{transform_indices = @transform_0, window_bounds = array<i64: 6, 8, 512>}, {pipeline_mode = #tpu.pipeline_mode<synchronous>, transform_indices = @transform_1, window_bounds = array<i64: 128, 512>}, {pipeline_mode = #tpu.pipeline_mode<synchronous>, transform_indices = @transform_2, window_bounds = array<i64: 128, 128>}, {pipeline_mode = #tpu.pipeline_mode<synchronous>, transform_indices = @transform_3, window_bounds = array<i64: 8, 128>}, {pipeline_mode = #tpu.pipeline_mode<synchronous>, transform_indices = @transform_4, window_bounds = array<i64: 8, 128>}, {pipeline_mode = #tpu.pipeline_mode<synchronous>, transform_indices = @transform_5, window_bounds = array<i64: 8, 128>}, {transform_indices = @transform_6, window_bounds = array<i64: 6, 8, 128>}, {pipeline_mode = #tpu.pipeline_mode<synchronous>, transform_indices = @transform_7, window_bounds = array<i64: 8, 128>}, {pipeline_mode = #tpu.pipeline_mode<synchronous>, transform_indices = @transform_8, window_bounds = array<i64: 8, 128>}]} {
    %c0_i32 = arith.constant 0 : i32
    %0 = arith.cmpi eq, %arg0, %c0_i32 : i32
    %1 = arith.extui %0 : i1 to i32
    %c0_i32_0 = arith.constant 0 : i32
    %2 = arith.cmpi ne, %1, %c0_i32_0 : i32
    scf.if %2 {
      %c0_110 = arith.constant 0 : index
      %c0_111 = arith.constant 0 : index
      %301 = vector.load %arg5[%c0_110, %c0_111] : memref<8x128xf32, #tpu.memory_space<vmem>>, vector<8x128xf32>
      %c0_112 = arith.constant 0 : index
      %c0_113 = arith.constant 0 : index
      %302 = vector.load %arg8[%c0_112, %c0_113] : memref<8x128xf32, #tpu.memory_space<vmem>>, vector<8x128xf32>
      tpu.vector_store %arg8[%c0_112, %c0_113], %301 {strides = array<i32>} : memref<8x128xf32, #tpu.memory_space<vmem>>, vector<8x128xf32>,
      %c0_114 = arith.constant 0 : index
      %c0_115 = arith.constant 0 : index
      %303 = vector.load %arg6[%c0_114, %c0_115] : memref<8x128xf32, #tpu.memory_space<vmem>>, vector<8x128xf32>
      %c0_116 = arith.constant 0 : index
      %c0_117 = arith.constant 0 : index
      %304 = vector.load %arg9[%c0_116, %c0_117] : memref<8x128xf32, #tpu.memory_space<vmem>>, vector<8x128xf32>
      tpu.vector_store %arg9[%c0_116, %c0_117], %303 {strides = array<i32>} : memref<8x128xf32, #tpu.memory_space<vmem>>, vector<8x128xf32>,
    } else {
    }
    %c0 = arith.constant 0 : index
    %c0_1 = arith.constant 0 : index
    %3 = vector.load %arg8[%c0, %c0_1] : memref<8x128xf32, #tpu.memory_space<vmem>>, vector<8x128xf32>
    %c0_2 = arith.constant 0 : index
    %c0_3 = arith.constant 0 : index
    %4 = vector.load %arg9[%c0_2, %c0_3] : memref<8x128xf32, #tpu.memory_space<vmem>>, vector<8x128xf32>
    %c0_i32_4 = arith.constant 0 : i32
    %5 = arith.index_cast %c0_i32_4 : i32 to index
    %c0_5 = arith.constant 0 : index
    %c0_6 = arith.constant 0 : index
    %6 = vector.load %arg1[%5, %c0_5, %c0_6] : memref<6x8x512xf32, #tpu.memory_space<vmem>>, vector<1x8x512xf32>
    %7 = vector.shape_cast %6 : vector<1x8x512xf32> to vector<8x512xf32>
    %c0_7 = arith.constant 0 : index
    %c0_8 = arith.constant 0 : index
    %8 = vector.load %arg2[%c0_7, %c0_8] : memref<128x512xf32, #tpu.memory_space<vmem>>, vector<128x512xf32>
    %cst = arith.constant dense<0.000000e+00> : vector<8x512xf32>
    %9 = tpu.matmul %3, %8, %cst {dimension_numbers = #tpu.dot_dimension_numbers<[1], [0], [0], [1], [0, 0, 1, 1], [], []>} : vector<8x128xf32>, vector<128x512xf32>, vector<8x512xf32> -> vector<8x512xf32>
    %10 = arith.addf %7, %9 : vector<8x512xf32>
    %11 = vector.extract_strided_slice %10 {offsets = [0, 0], sizes = [8, 128], strides = [1, 1]} : vector<8x512xf32> to vector<8x128xf32>
    %12 = arith.negf %11 : vector<8x128xf32>
    %13 = math.exp %12 : vector<8x128xf32>
    %cst_9 = arith.constant 1.000000e+00 : f32
    %14 = vector.broadcast %cst_9 : f32 to vector<8x128xf32>
    %15 = arith.addf %14, %13 : vector<8x128xf32>
    %16 = arith.divf %14, %15 : vector<8x128xf32>
    %17 = vector.extract_strided_slice %10 {offsets = [0, 128], sizes = [8, 128], strides = [1, 1]} : vector<8x512xf32> to vector<8x128xf32>
    %18 = arith.negf %17 : vector<8x128xf32>
    %19 = math.exp %18 : vector<8x128xf32>
    %cst_10 = arith.constant 1.000000e+00 : f32
    %20 = vector.broadcast %cst_10 : f32 to vector<8x128xf32>
    %21 = arith.addf %20, %19 : vector<8x128xf32>
    %22 = arith.divf %20, %21 : vector<8x128xf32>
    %23 = vector.extract_strided_slice %10 {offsets = [0, 256], sizes = [8, 128], strides = [1, 1]} : vector<8x512xf32> to vector<8x128xf32>
    %24 = math.tanh %23 : vector<8x128xf32>
    %25 = vector.extract_strided_slice %10 {offsets = [0, 384], sizes = [8, 128], strides = [1, 1]} : vector<8x512xf32> to vector<8x128xf32>
    %26 = arith.negf %25 : vector<8x128xf32>
    %27 = math.exp %26 : vector<8x128xf32>
    %cst_11 = arith.constant 1.000000e+00 : f32
    %28 = vector.broadcast %cst_11 : f32 to vector<8x128xf32>
    %29 = arith.addf %28, %27 : vector<8x128xf32>
    %30 = arith.divf %28, %29 : vector<8x128xf32>
    %31 = arith.mulf %22, %4 : vector<8x128xf32>
    %32 = arith.mulf %16, %24 : vector<8x128xf32>
    %33 = arith.addf %31, %32 : vector<8x128xf32>
    %34 = math.tanh %33 : vector<8x128xf32>
    %35 = arith.mulf %30, %34 : vector<8x128xf32>
    %c0_12 = arith.constant 0 : index
    %c0_13 = arith.constant 0 : index
    %36 = vector.load %arg3[%c0_12, %c0_13] : memref<128x128xf32, #tpu.memory_space<vmem>>, vector<128x128xf32>
    %cst_14 = arith.constant dense<0.000000e+00> : vector<8x128xf32>
    %37 = tpu.matmul %35, %36, %cst_14 {dimension_numbers = #tpu.dot_dimension_numbers<[1], [0], [0], [1], [0, 0, 1, 1], [], []>} : vector<8x128xf32>, vector<128x128xf32>, vector<8x128xf32> -> vector<8x128xf32>
    %c0_15 = arith.constant 0 : index
    %c0_16 = arith.constant 0 : index
    %38 = vector.load %arg4[%c0_15, %c0_16] : memref<8x128xf32, #tpu.memory_space<vmem>>, vector<8x128xf32>
    %39 = arith.addf %37, %38 : vector<8x128xf32>
    %cst_17 = arith.constant dense<0xFF800000> : vector<8xf32>
    %40 = vector.multi_reduction <maximumf>, %39, %cst_17 [1] : vector<8x128xf32> to vector<8xf32>
    %41 = vector.shape_cast %40 : vector<8xf32> to vector<8x1xf32>
    %42 = vector.broadcast %41 : vector<8x1xf32> to vector<8x128xf32>
    %43 = arith.subf %39, %42 : vector<8x128xf32>
    %44 = math.exp %43 : vector<8x128xf32>
    %cst_18 = arith.constant dense<0.000000e+00> : vector<8xf32>
    %45 = vector.multi_reduction <add>, %44, %cst_18 [1] : vector<8x128xf32> to vector<8xf32>
    %46 = vector.shape_cast %45 : vector<8xf32> to vector<8x1xf32>
    %47 = math.log %46 : vector<8x1xf32>
    %48 = vector.broadcast %47 : vector<8x1xf32> to vector<8x128xf32>
    %49 = arith.subf %43, %48 : vector<8x128xf32>
    %50 = arith.index_cast %c0_i32_4 : i32 to index
    %c0_19 = arith.constant 0 : index
    %c0_20 = arith.constant 0 : index
    %51 = vector.load %arg7[%50, %c0_19, %c0_20] : memref<6x8x128xf32, #tpu.memory_space<vmem>>, vector<1x8x128xf32>
    %52 = vector.shape_cast %51 : vector<1x8x128xf32> to vector<8x128xf32>
    %53 = vector.shape_cast %49 : vector<8x128xf32> to vector<1x8x128xf32>
    tpu.vector_store %arg7[%50, %c0_19, %c0_20], %53 {strides = array<i32>} : memref<6x8x128xf32, #tpu.memory_space<vmem>>, vector<1x8x128xf32>,
    %c1_i32 = arith.constant 1 : i32
    %54 = arith.index_cast %c1_i32 : i32 to index
    %c0_21 = arith.constant 0 : index
    %c0_22 = arith.constant 0 : index
    %55 = vector.load %arg1[%54, %c0_21, %c0_22] : memref<6x8x512xf32, #tpu.memory_space<vmem>>, vector<1x8x512xf32>
    %56 = vector.shape_cast %55 : vector<1x8x512xf32> to vector<8x512xf32>
    %c0_23 = arith.constant 0 : index
    %c0_24 = arith.constant 0 : index
    %57 = vector.load %arg2[%c0_23, %c0_24] : memref<128x512xf32, #tpu.memory_space<vmem>>, vector<128x512xf32>
    %cst_25 = arith.constant dense<0.000000e+00> : vector<8x512xf32>
    %58 = tpu.matmul %35, %57, %cst_25 {dimension_numbers = #tpu.dot_dimension_numbers<[1], [0], [0], [1], [0, 0, 1, 1], [], []>} : vector<8x128xf32>, vector<128x512xf32>, vector<8x512xf32> -> vector<8x512xf32>
    %59 = arith.addf %56, %58 : vector<8x512xf32>
    %60 = vector.extract_strided_slice %59 {offsets = [0, 0], sizes = [8, 128], strides = [1, 1]} : vector<8x512xf32> to vector<8x128xf32>
    %61 = arith.negf %60 : vector<8x128xf32>
    %62 = math.exp %61 : vector<8x128xf32>
    %cst_26 = arith.constant 1.000000e+00 : f32
    %63 = vector.broadcast %cst_26 : f32 to vector<8x128xf32>
    %64 = arith.addf %63, %62 : vector<8x128xf32>
    %65 = arith.divf %63, %64 : vector<8x128xf32>
    %66 = vector.extract_strided_slice %59 {offsets = [0, 128], sizes = [8, 128], strides = [1, 1]} : vector<8x512xf32> to vector<8x128xf32>
    %67 = arith.negf %66 : vector<8x128xf32>
    %68 = math.exp %67 : vector<8x128xf32>
    %cst_27 = arith.constant 1.000000e+00 : f32
    %69 = vector.broadcast %cst_27 : f32 to vector<8x128xf32>
    %70 = arith.addf %69, %68 : vector<8x128xf32>
    %71 = arith.divf %69, %70 : vector<8x128xf32>
    %72 = vector.extract_strided_slice %59 {offsets = [0, 256], sizes = [8, 128], strides = [1, 1]} : vector<8x512xf32> to vector<8x128xf32>
    %73 = math.tanh %72 : vector<8x128xf32>
    %74 = vector.extract_strided_slice %59 {offsets = [0, 384], sizes = [8, 128], strides = [1, 1]} : vector<8x512xf32> to vector<8x128xf32>
    %75 = arith.negf %74 : vector<8x128xf32>
    %76 = math.exp %75 : vector<8x128xf32>
    %cst_28 = arith.constant 1.000000e+00 : f32
    %77 = vector.broadcast %cst_28 : f32 to vector<8x128xf32>
    %78 = arith.addf %77, %76 : vector<8x128xf32>
    %79 = arith.divf %77, %78 : vector<8x128xf32>
    %80 = arith.mulf %71, %33 : vector<8x128xf32>
    %81 = arith.mulf %65, %73 : vector<8x128xf32>
    %82 = arith.addf %80, %81 : vector<8x128xf32>
    %83 = math.tanh %82 : vector<8x128xf32>
    %84 = arith.mulf %79, %83 : vector<8x128xf32>
    %c0_29 = arith.constant 0 : index
    %c0_30 = arith.constant 0 : index
    %85 = vector.load %arg3[%c0_29, %c0_30] : memref<128x128xf32, #tpu.memory_space<vmem>>, vector<128x128xf32>
    %cst_31 = arith.constant dense<0.000000e+00> : vector<8x128xf32>
    %86 = tpu.matmul %84, %85, %cst_31 {dimension_numbers = #tpu.dot_dimension_numbers<[1], [0], [0], [1], [0, 0, 1, 1], [], []>} : vector<8x128xf32>, vector<128x128xf32>, vector<8x128xf32> -> vector<8x128xf32>
    %c0_32 = arith.constant 0 : index
    %c0_33 = arith.constant 0 : index
    %87 = vector.load %arg4[%c0_32, %c0_33] : memref<8x128xf32, #tpu.memory_space<vmem>>, vector<8x128xf32>
    %88 = arith.addf %86, %87 : vector<8x128xf32>
    %cst_34 = arith.constant dense<0xFF800000> : vector<8xf32>
    %89 = vector.multi_reduction <maximumf>, %88, %cst_34 [1] : vector<8x128xf32> to vector<8xf32>
    %90 = vector.shape_cast %89 : vector<8xf32> to vector<8x1xf32>
    %91 = vector.broadcast %90 : vector<8x1xf32> to vector<8x128xf32>
    %92 = arith.subf %88, %91 : vector<8x128xf32>
    %93 = math.exp %92 : vector<8x128xf32>
    %cst_35 = arith.constant dense<0.000000e+00> : vector<8xf32>
    %94 = vector.multi_reduction <add>, %93, %cst_35 [1] : vector<8x128xf32> to vector<8xf32>
    %95 = vector.shape_cast %94 : vector<8xf32> to vector<8x1xf32>
    %96 = math.log %95 : vector<8x1xf32>
    %97 = vector.broadcast %96 : vector<8x1xf32> to vector<8x128xf32>
    %98 = arith.subf %92, %97 : vector<8x128xf32>
    %99 = arith.index_cast %c1_i32 : i32 to index
    %c0_36 = arith.constant 0 : index
    %c0_37 = arith.constant 0 : index
    %100 = vector.load %arg7[%99, %c0_36, %c0_37] : memref<6x8x128xf32, #tpu.memory_space<vmem>>, vector<1x8x128xf32>
    %101 = vector.shape_cast %100 : vector<1x8x128xf32> to vector<8x128xf32>
    %102 = vector.shape_cast %98 : vector<8x128xf32> to vector<1x8x128xf32>
    tpu.vector_store %arg7[%99, %c0_36, %c0_37], %102 {strides = array<i32>} : memref<6x8x128xf32, #tpu.memory_space<vmem>>, vector<1x8x128xf32>,
    %c2_i32 = arith.constant 2 : i32
    %103 = arith.index_cast %c2_i32 : i32 to index
    %c0_38 = arith.constant 0 : index
    %c0_39 = arith.constant 0 : index
    %104 = vector.load %arg1[%103, %c0_38, %c0_39] : memref<6x8x512xf32, #tpu.memory_space<vmem>>, vector<1x8x512xf32>
    %105 = vector.shape_cast %104 : vector<1x8x512xf32> to vector<8x512xf32>
    %c0_40 = arith.constant 0 : index
    %c0_41 = arith.constant 0 : index
    %106 = vector.load %arg2[%c0_40, %c0_41] : memref<128x512xf32, #tpu.memory_space<vmem>>, vector<128x512xf32>
    %cst_42 = arith.constant dense<0.000000e+00> : vector<8x512xf32>
    %107 = tpu.matmul %84, %106, %cst_42 {dimension_numbers = #tpu.dot_dimension_numbers<[1], [0], [0], [1], [0, 0, 1, 1], [], []>} : vector<8x128xf32>, vector<128x512xf32>, vector<8x512xf32> -> vector<8x512xf32>
    %108 = arith.addf %105, %107 : vector<8x512xf32>
    %109 = vector.extract_strided_slice %108 {offsets = [0, 0], sizes = [8, 128], strides = [1, 1]} : vector<8x512xf32> to vector<8x128xf32>
    %110 = arith.negf %109 : vector<8x128xf32>
    %111 = math.exp %110 : vector<8x128xf32>
    %cst_43 = arith.constant 1.000000e+00 : f32
    %112 = vector.broadcast %cst_43 : f32 to vector<8x128xf32>
    %113 = arith.addf %112, %111 : vector<8x128xf32>
    %114 = arith.divf %112, %113 : vector<8x128xf32>
    %115 = vector.extract_strided_slice %108 {offsets = [0, 128], sizes = [8, 128], strides = [1, 1]} : vector<8x512xf32> to vector<8x128xf32>
    %116 = arith.negf %115 : vector<8x128xf32>
    %117 = math.exp %116 : vector<8x128xf32>
    %cst_44 = arith.constant 1.000000e+00 : f32
    %118 = vector.broadcast %cst_44 : f32 to vector<8x128xf32>
    %119 = arith.addf %118, %117 : vector<8x128xf32>
    %120 = arith.divf %118, %119 : vector<8x128xf32>
    %121 = vector.extract_strided_slice %108 {offsets = [0, 256], sizes = [8, 128], strides = [1, 1]} : vector<8x512xf32> to vector<8x128xf32>
    %122 = math.tanh %121 : vector<8x128xf32>
    %123 = vector.extract_strided_slice %108 {offsets = [0, 384], sizes = [8, 128], strides = [1, 1]} : vector<8x512xf32> to vector<8x128xf32>
    %124 = arith.negf %123 : vector<8x128xf32>
    %125 = math.exp %124 : vector<8x128xf32>
    %cst_45 = arith.constant 1.000000e+00 : f32
    %126 = vector.broadcast %cst_45 : f32 to vector<8x128xf32>
    %127 = arith.addf %126, %125 : vector<8x128xf32>
    %128 = arith.divf %126, %127 : vector<8x128xf32>
    %129 = arith.mulf %120, %82 : vector<8x128xf32>
    %130 = arith.mulf %114, %122 : vector<8x128xf32>
    %131 = arith.addf %129, %130 : vector<8x128xf32>
    %132 = math.tanh %131 : vector<8x128xf32>
    %133 = arith.mulf %128, %132 : vector<8x128xf32>
    %c0_46 = arith.constant 0 : index
    %c0_47 = arith.constant 0 : index
    %134 = vector.load %arg3[%c0_46, %c0_47] : memref<128x128xf32, #tpu.memory_space<vmem>>, vector<128x128xf32>
    %cst_48 = arith.constant dense<0.000000e+00> : vector<8x128xf32>
    %135 = tpu.matmul %133, %134, %cst_48 {dimension_numbers = #tpu.dot_dimension_numbers<[1], [0], [0], [1], [0, 0, 1, 1], [], []>} : vector<8x128xf32>, vector<128x128xf32>, vector<8x128xf32> -> vector<8x128xf32>
    %c0_49 = arith.constant 0 : index
    %c0_50 = arith.constant 0 : index
    %136 = vector.load %arg4[%c0_49, %c0_50] : memref<8x128xf32, #tpu.memory_space<vmem>>, vector<8x128xf32>
    %137 = arith.addf %135, %136 : vector<8x128xf32>
    %cst_51 = arith.constant dense<0xFF800000> : vector<8xf32>
    %138 = vector.multi_reduction <maximumf>, %137, %cst_51 [1] : vector<8x128xf32> to vector<8xf32>
    %139 = vector.shape_cast %138 : vector<8xf32> to vector<8x1xf32>
    %140 = vector.broadcast %139 : vector<8x1xf32> to vector<8x128xf32>
    %141 = arith.subf %137, %140 : vector<8x128xf32>
    %142 = math.exp %141 : vector<8x128xf32>
    %cst_52 = arith.constant dense<0.000000e+00> : vector<8xf32>
    %143 = vector.multi_reduction <add>, %142, %cst_52 [1] : vector<8x128xf32> to vector<8xf32>
    %144 = vector.shape_cast %143 : vector<8xf32> to vector<8x1xf32>
    %145 = math.log %144 : vector<8x1xf32>
    %146 = vector.broadcast %145 : vector<8x1xf32> to vector<8x128xf32>
    %147 = arith.subf %141, %146 : vector<8x128xf32>
    %148 = arith.index_cast %c2_i32 : i32 to index
    %c0_53 = arith.constant 0 : index
    %c0_54 = arith.constant 0 : index
    %149 = vector.load %arg7[%148, %c0_53, %c0_54] : memref<6x8x128xf32, #tpu.memory_space<vmem>>, vector<1x8x128xf32>
    %150 = vector.shape_cast %149 : vector<1x8x128xf32> to vector<8x128xf32>
    %151 = vector.shape_cast %147 : vector<8x128xf32> to vector<1x8x128xf32>
    tpu.vector_store %arg7[%148, %c0_53, %c0_54], %151 {strides = array<i32>} : memref<6x8x128xf32, #tpu.memory_space<vmem>>, vector<1x8x128xf32>,
    %c3_i32 = arith.constant 3 : i32
    %152 = arith.index_cast %c3_i32 : i32 to index
    %c0_55 = arith.constant 0 : index
    %c0_56 = arith.constant 0 : index
    %153 = vector.load %arg1[%152, %c0_55, %c0_56] : memref<6x8x512xf32, #tpu.memory_space<vmem>>, vector<1x8x512xf32>
    %154 = vector.shape_cast %153 : vector<1x8x512xf32> to vector<8x512xf32>
    %c0_57 = arith.constant 0 : index
    %c0_58 = arith.constant 0 : index
    %155 = vector.load %arg2[%c0_57, %c0_58] : memref<128x512xf32, #tpu.memory_space<vmem>>, vector<128x512xf32>
    %cst_59 = arith.constant dense<0.000000e+00> : vector<8x512xf32>
    %156 = tpu.matmul %133, %155, %cst_59 {dimension_numbers = #tpu.dot_dimension_numbers<[1], [0], [0], [1], [0, 0, 1, 1], [], []>} : vector<8x128xf32>, vector<128x512xf32>, vector<8x512xf32> -> vector<8x512xf32>
    %157 = arith.addf %154, %156 : vector<8x512xf32>
    %158 = vector.extract_strided_slice %157 {offsets = [0, 0], sizes = [8, 128], strides = [1, 1]} : vector<8x512xf32> to vector<8x128xf32>
    %159 = arith.negf %158 : vector<8x128xf32>
    %160 = math.exp %159 : vector<8x128xf32>
    %cst_60 = arith.constant 1.000000e+00 : f32
    %161 = vector.broadcast %cst_60 : f32 to vector<8x128xf32>
    %162 = arith.addf %161, %160 : vector<8x128xf32>
    %163 = arith.divf %161, %162 : vector<8x128xf32>
    %164 = vector.extract_strided_slice %157 {offsets = [0, 128], sizes = [8, 128], strides = [1, 1]} : vector<8x512xf32> to vector<8x128xf32>
    %165 = arith.negf %164 : vector<8x128xf32>
    %166 = math.exp %165 : vector<8x128xf32>
    %cst_61 = arith.constant 1.000000e+00 : f32
    %167 = vector.broadcast %cst_61 : f32 to vector<8x128xf32>
    %168 = arith.addf %167, %166 : vector<8x128xf32>
    %169 = arith.divf %167, %168 : vector<8x128xf32>
    %170 = vector.extract_strided_slice %157 {offsets = [0, 256], sizes = [8, 128], strides = [1, 1]} : vector<8x512xf32> to vector<8x128xf32>
    %171 = math.tanh %170 : vector<8x128xf32>
    %172 = vector.extract_strided_slice %157 {offsets = [0, 384], sizes = [8, 128], strides = [1, 1]} : vector<8x512xf32> to vector<8x128xf32>
    %173 = arith.negf %172 : vector<8x128xf32>
    %174 = math.exp %173 : vector<8x128xf32>
    %cst_62 = arith.constant 1.000000e+00 : f32
    %175 = vector.broadcast %cst_62 : f32 to vector<8x128xf32>
    %176 = arith.addf %175, %174 : vector<8x128xf32>
    %177 = arith.divf %175, %176 : vector<8x128xf32>
    %178 = arith.mulf %169, %131 : vector<8x128xf32>
    %179 = arith.mulf %163, %171 : vector<8x128xf32>
    %180 = arith.addf %178, %179 : vector<8x128xf32>
    %181 = math.tanh %180 : vector<8x128xf32>
    %182 = arith.mulf %177, %181 : vector<8x128xf32>
    %c0_63 = arith.constant 0 : index
    %c0_64 = arith.constant 0 : index
    %183 = vector.load %arg3[%c0_63, %c0_64] : memref<128x128xf32, #tpu.memory_space<vmem>>, vector<128x128xf32>
    %cst_65 = arith.constant dense<0.000000e+00> : vector<8x128xf32>
    %184 = tpu.matmul %182, %183, %cst_65 {dimension_numbers = #tpu.dot_dimension_numbers<[1], [0], [0], [1], [0, 0, 1, 1], [], []>} : vector<8x128xf32>, vector<128x128xf32>, vector<8x128xf32> -> vector<8x128xf32>
    %c0_66 = arith.constant 0 : index
    %c0_67 = arith.constant 0 : index
    %185 = vector.load %arg4[%c0_66, %c0_67] : memref<8x128xf32, #tpu.memory_space<vmem>>, vector<8x128xf32>
    %186 = arith.addf %184, %185 : vector<8x128xf32>
    %cst_68 = arith.constant dense<0xFF800000> : vector<8xf32>
    %187 = vector.multi_reduction <maximumf>, %186, %cst_68 [1] : vector<8x128xf32> to vector<8xf32>
    %188 = vector.shape_cast %187 : vector<8xf32> to vector<8x1xf32>
    %189 = vector.broadcast %188 : vector<8x1xf32> to vector<8x128xf32>
    %190 = arith.subf %186, %189 : vector<8x128xf32>
    %191 = math.exp %190 : vector<8x128xf32>
    %cst_69 = arith.constant dense<0.000000e+00> : vector<8xf32>
    %192 = vector.multi_reduction <add>, %191, %cst_69 [1] : vector<8x128xf32> to vector<8xf32>
    %193 = vector.shape_cast %192 : vector<8xf32> to vector<8x1xf32>
    %194 = math.log %193 : vector<8x1xf32>
    %195 = vector.broadcast %194 : vector<8x1xf32> to vector<8x128xf32>
    %196 = arith.subf %190, %195 : vector<8x128xf32>
    %197 = arith.index_cast %c3_i32 : i32 to index
    %c0_70 = arith.constant 0 : index
    %c0_71 = arith.constant 0 : index
    %198 = vector.load %arg7[%197, %c0_70, %c0_71] : memref<6x8x128xf32, #tpu.memory_space<vmem>>, vector<1x8x128xf32>
    %199 = vector.shape_cast %198 : vector<1x8x128xf32> to vector<8x128xf32>
    %200 = vector.shape_cast %196 : vector<8x128xf32> to vector<1x8x128xf32>
    tpu.vector_store %arg7[%197, %c0_70, %c0_71], %200 {strides = array<i32>} : memref<6x8x128xf32, #tpu.memory_space<vmem>>, vector<1x8x128xf32>,
    %c4_i32 = arith.constant 4 : i32
    %201 = arith.index_cast %c4_i32 : i32 to index
    %c0_72 = arith.constant 0 : index
    %c0_73 = arith.constant 0 : index
    %202 = vector.load %arg1[%201, %c0_72, %c0_73] : memref<6x8x512xf32, #tpu.memory_space<vmem>>, vector<1x8x512xf32>
    %203 = vector.shape_cast %202 : vector<1x8x512xf32> to vector<8x512xf32>
    %c0_74 = arith.constant 0 : index
    %c0_75 = arith.constant 0 : index
    %204 = vector.load %arg2[%c0_74, %c0_75] : memref<128x512xf32, #tpu.memory_space<vmem>>, vector<128x512xf32>
    %cst_76 = arith.constant dense<0.000000e+00> : vector<8x512xf32>
    %205 = tpu.matmul %182, %204, %cst_76 {dimension_numbers = #tpu.dot_dimension_numbers<[1], [0], [0], [1], [0, 0, 1, 1], [], []>} : vector<8x128xf32>, vector<128x512xf32>, vector<8x512xf32> -> vector<8x512xf32>
    %206 = arith.addf %203, %205 : vector<8x512xf32>
    %207 = vector.extract_strided_slice %206 {offsets = [0, 0], sizes = [8, 128], strides = [1, 1]} : vector<8x512xf32> to vector<8x128xf32>
    %208 = arith.negf %207 : vector<8x128xf32>
    %209 = math.exp %208 : vector<8x128xf32>
    %cst_77 = arith.constant 1.000000e+00 : f32
    %210 = vector.broadcast %cst_77 : f32 to vector<8x128xf32>
    %211 = arith.addf %210, %209 : vector<8x128xf32>
    %212 = arith.divf %210, %211 : vector<8x128xf32>
    %213 = vector.extract_strided_slice %206 {offsets = [0, 128], sizes = [8, 128], strides = [1, 1]} : vector<8x512xf32> to vector<8x128xf32>
    %214 = arith.negf %213 : vector<8x128xf32>
    %215 = math.exp %214 : vector<8x128xf32>
    %cst_78 = arith.constant 1.000000e+00 : f32
    %216 = vector.broadcast %cst_78 : f32 to vector<8x128xf32>
    %217 = arith.addf %216, %215 : vector<8x128xf32>
    %218 = arith.divf %216, %217 : vector<8x128xf32>
    %219 = vector.extract_strided_slice %206 {offsets = [0, 256], sizes = [8, 128], strides = [1, 1]} : vector<8x512xf32> to vector<8x128xf32>
    %220 = math.tanh %219 : vector<8x128xf32>
    %221 = vector.extract_strided_slice %206 {offsets = [0, 384], sizes = [8, 128], strides = [1, 1]} : vector<8x512xf32> to vector<8x128xf32>
    %222 = arith.negf %221 : vector<8x128xf32>
    %223 = math.exp %222 : vector<8x128xf32>
    %cst_79 = arith.constant 1.000000e+00 : f32
    %224 = vector.broadcast %cst_79 : f32 to vector<8x128xf32>
    %225 = arith.addf %224, %223 : vector<8x128xf32>
    %226 = arith.divf %224, %225 : vector<8x128xf32>
    %227 = arith.mulf %218, %180 : vector<8x128xf32>
    %228 = arith.mulf %212, %220 : vector<8x128xf32>
    %229 = arith.addf %227, %228 : vector<8x128xf32>
    %230 = math.tanh %229 : vector<8x128xf32>
    %231 = arith.mulf %226, %230 : vector<8x128xf32>
    %c0_80 = arith.constant 0 : index
    %c0_81 = arith.constant 0 : index
    %232 = vector.load %arg3[%c0_80, %c0_81] : memref<128x128xf32, #tpu.memory_space<vmem>>, vector<128x128xf32>
    %cst_82 = arith.constant dense<0.000000e+00> : vector<8x128xf32>
    %233 = tpu.matmul %231, %232, %cst_82 {dimension_numbers = #tpu.dot_dimension_numbers<[1], [0], [0], [1], [0, 0, 1, 1], [], []>} : vector<8x128xf32>, vector<128x128xf32>, vector<8x128xf32> -> vector<8x128xf32>
    %c0_83 = arith.constant 0 : index
    %c0_84 = arith.constant 0 : index
    %234 = vector.load %arg4[%c0_83, %c0_84] : memref<8x128xf32, #tpu.memory_space<vmem>>, vector<8x128xf32>
    %235 = arith.addf %233, %234 : vector<8x128xf32>
    %cst_85 = arith.constant dense<0xFF800000> : vector<8xf32>
    %236 = vector.multi_reduction <maximumf>, %235, %cst_85 [1] : vector<8x128xf32> to vector<8xf32>
    %237 = vector.shape_cast %236 : vector<8xf32> to vector<8x1xf32>
    %238 = vector.broadcast %237 : vector<8x1xf32> to vector<8x128xf32>
    %239 = arith.subf %235, %238 : vector<8x128xf32>
    %240 = math.exp %239 : vector<8x128xf32>
    %cst_86 = arith.constant dense<0.000000e+00> : vector<8xf32>
    %241 = vector.multi_reduction <add>, %240, %cst_86 [1] : vector<8x128xf32> to vector<8xf32>
    %242 = vector.shape_cast %241 : vector<8xf32> to vector<8x1xf32>
    %243 = math.log %242 : vector<8x1xf32>
    %244 = vector.broadcast %243 : vector<8x1xf32> to vector<8x128xf32>
    %245 = arith.subf %239, %244 : vector<8x128xf32>
    %246 = arith.index_cast %c4_i32 : i32 to index
    %c0_87 = arith.constant 0 : index
    %c0_88 = arith.constant 0 : index
    %247 = vector.load %arg7[%246, %c0_87, %c0_88] : memref<6x8x128xf32, #tpu.memory_space<vmem>>, vector<1x8x128xf32>
    %248 = vector.shape_cast %247 : vector<1x8x128xf32> to vector<8x128xf32>
    %249 = vector.shape_cast %245 : vector<8x128xf32> to vector<1x8x128xf32>
    tpu.vector_store %arg7[%246, %c0_87, %c0_88], %249 {strides = array<i32>} : memref<6x8x128xf32, #tpu.memory_space<vmem>>, vector<1x8x128xf32>,
    %c5_i32 = arith.constant 5 : i32
    %250 = arith.index_cast %c5_i32 : i32 to index
    %c0_89 = arith.constant 0 : index
    %c0_90 = arith.constant 0 : index
    %251 = vector.load %arg1[%250, %c0_89, %c0_90] : memref<6x8x512xf32, #tpu.memory_space<vmem>>, vector<1x8x512xf32>
    %252 = vector.shape_cast %251 : vector<1x8x512xf32> to vector<8x512xf32>
    %c0_91 = arith.constant 0 : index
    %c0_92 = arith.constant 0 : index
    %253 = vector.load %arg2[%c0_91, %c0_92] : memref<128x512xf32, #tpu.memory_space<vmem>>, vector<128x512xf32>
    %cst_93 = arith.constant dense<0.000000e+00> : vector<8x512xf32>
    %254 = tpu.matmul %231, %253, %cst_93 {dimension_numbers = #tpu.dot_dimension_numbers<[1], [0], [0], [1], [0, 0, 1, 1], [], []>} : vector<8x128xf32>, vector<128x512xf32>, vector<8x512xf32> -> vector<8x512xf32>
    %255 = arith.addf %252, %254 : vector<8x512xf32>
    %256 = vector.extract_strided_slice %255 {offsets = [0, 0], sizes = [8, 128], strides = [1, 1]} : vector<8x512xf32> to vector<8x128xf32>
    %257 = arith.negf %256 : vector<8x128xf32>
    %258 = math.exp %257 : vector<8x128xf32>
    %cst_94 = arith.constant 1.000000e+00 : f32
    %259 = vector.broadcast %cst_94 : f32 to vector<8x128xf32>
    %260 = arith.addf %259, %258 : vector<8x128xf32>
    %261 = arith.divf %259, %260 : vector<8x128xf32>
    %262 = vector.extract_strided_slice %255 {offsets = [0, 128], sizes = [8, 128], strides = [1, 1]} : vector<8x512xf32> to vector<8x128xf32>
    %263 = arith.negf %262 : vector<8x128xf32>
    %264 = math.exp %263 : vector<8x128xf32>
    %cst_95 = arith.constant 1.000000e+00 : f32
    %265 = vector.broadcast %cst_95 : f32 to vector<8x128xf32>
    %266 = arith.addf %265, %264 : vector<8x128xf32>
    %267 = arith.divf %265, %266 : vector<8x128xf32>
    %268 = vector.extract_strided_slice %255 {offsets = [0, 256], sizes = [8, 128], strides = [1, 1]} : vector<8x512xf32> to vector<8x128xf32>
    %269 = math.tanh %268 : vector<8x128xf32>
    %270 = vector.extract_strided_slice %255 {offsets = [0, 384], sizes = [8, 128], strides = [1, 1]} : vector<8x512xf32> to vector<8x128xf32>
    %271 = arith.negf %270 : vector<8x128xf32>
    %272 = math.exp %271 : vector<8x128xf32>
    %cst_96 = arith.constant 1.000000e+00 : f32
    %273 = vector.broadcast %cst_96 : f32 to vector<8x128xf32>
    %274 = arith.addf %273, %272 : vector<8x128xf32>
    %275 = arith.divf %273, %274 : vector<8x128xf32>
    %276 = arith.mulf %267, %229 : vector<8x128xf32>
    %277 = arith.mulf %261, %269 : vector<8x128xf32>
    %278 = arith.addf %276, %277 : vector<8x128xf32>
    %279 = math.tanh %278 : vector<8x128xf32>
    %280 = arith.mulf %275, %279 : vector<8x128xf32>
    %c0_97 = arith.constant 0 : index
    %c0_98 = arith.constant 0 : index
    %281 = vector.load %arg3[%c0_97, %c0_98] : memref<128x128xf32, #tpu.memory_space<vmem>>, vector<128x128xf32>
    %cst_99 = arith.constant dense<0.000000e+00> : vector<8x128xf32>
    %282 = tpu.matmul %280, %281, %cst_99 {dimension_numbers = #tpu.dot_dimension_numbers<[1], [0], [0], [1], [0, 0, 1, 1], [], []>} : vector<8x128xf32>, vector<128x128xf32>, vector<8x128xf32> -> vector<8x128xf32>
    %c0_100 = arith.constant 0 : index
    %c0_101 = arith.constant 0 : index
    %283 = vector.load %arg4[%c0_100, %c0_101] : memref<8x128xf32, #tpu.memory_space<vmem>>, vector<8x128xf32>
    %284 = arith.addf %282, %283 : vector<8x128xf32>
    %cst_102 = arith.constant dense<0xFF800000> : vector<8xf32>
    %285 = vector.multi_reduction <maximumf>, %284, %cst_102 [1] : vector<8x128xf32> to vector<8xf32>
    %286 = vector.shape_cast %285 : vector<8xf32> to vector<8x1xf32>
    %287 = vector.broadcast %286 : vector<8x1xf32> to vector<8x128xf32>
    %288 = arith.subf %284, %287 : vector<8x128xf32>
    %289 = math.exp %288 : vector<8x128xf32>
    %cst_103 = arith.constant dense<0.000000e+00> : vector<8xf32>
    %290 = vector.multi_reduction <add>, %289, %cst_103 [1] : vector<8x128xf32> to vector<8xf32>
    %291 = vector.shape_cast %290 : vector<8xf32> to vector<8x1xf32>
    %292 = math.log %291 : vector<8x1xf32>
    %293 = vector.broadcast %292 : vector<8x1xf32> to vector<8x128xf32>
    %294 = arith.subf %288, %293 : vector<8x128xf32>
    %295 = arith.index_cast %c5_i32 : i32 to index
    %c0_104 = arith.constant 0 : index
    %c0_105 = arith.constant 0 : index
    %296 = vector.load %arg7[%295, %c0_104, %c0_105] : memref<6x8x128xf32, #tpu.memory_space<vmem>>, vector<1x8x128xf32>
    %297 = vector.shape_cast %296 : vector<1x8x128xf32> to vector<8x128xf32>
    %298 = vector.shape_cast %294 : vector<8x128xf32> to vector<1x8x128xf32>
    tpu.vector_store %arg7[%295, %c0_104, %c0_105], %298 {strides = array<i32>} : memref<6x8x128xf32, #tpu.memory_space<vmem>>, vector<1x8x128xf32>,
    %c6_i32 = arith.constant 6 : i32
    %c0_106 = arith.constant 0 : index
    %c0_107 = arith.constant 0 : index
    %299 = vector.load %arg8[%c0_106, %c0_107] : memref<8x128xf32, #tpu.memory_space<vmem>>, vector<8x128xf32>
    tpu.vector_store %arg8[%c0_106, %c0_107], %280 {strides = array<i32>} : memref<8x128xf32, #tpu.memory_space<vmem>>, vector<8x128xf32>,
    %c0_108 = arith.constant 0 : index
    %c0_109 = arith.constant 0 : index
    %300 = vector.load %arg9[%c0_108, %c0_109] : memref<8x128xf32, #tpu.memory_space<vmem>>, vector<8x128xf32>
    tpu.vector_store %arg9[%c0_108, %c0_109], %278 {strides = array<i32>} : memref<8x128xf32, #tpu.memory_space<vmem>>, vector<8x128xf32>,
    return
  }
  func.func @transform_0(%arg0: i32) -> (i32, i32, i32) {
    %c0_i32 = arith.constant 0 : i32
    %c0_i32_0 = arith.constant 0 : i32
    %c0_i32_1 = arith.constant 0 : i32
    return %arg0, %c0_i32, %c0_i32_0 : i32, i32, i32
  }
  func.func @transform_1(%arg0: i32) -> (i32, i32) {
    %c0_i32 = arith.constant 0 : i32
    %c0_i32_0 = arith.constant 0 : i32
    %c0_i32_1 = arith.constant 0 : i32
    return %c0_i32, %c0_i32_0 : i32, i32
  }
  func.func @transform_2(%arg0: i32) -> (i32, i32) {
    %c0_i32 = arith.constant 0 : i32
    %c0_i32_0 = arith.constant 0 : i32
    %c0_i32_1 = arith.constant 0 : i32
    return %c0_i32, %c0_i32_0 : i32, i32
  }
  func.func @transform_3(%arg0: i32) -> (i32, i32) {
    %c0_i32 = arith.constant 0 : i32
    %c0_i32_0 = arith.constant 0 : i32
    %c0_i32_1 = arith.constant 0 : i32
    return %c0_i32, %c0_i32_0 : i32, i32
  }
  func.func @transform_4(%arg0: i32) -> (i32, i32) {
    %c0_i32 = arith.constant 0 : i32
    %c0_i32_0 = arith.constant 0 : i32
    %c0_i32_1 = arith.constant 0 : i32
    return %c0_i32, %c0_i32_0 : i32, i32
  }
  func.func @transform_5(%arg0: i32) -> (i32, i32) {
    %c0_i32 = arith.constant 0 : i32
    %c0_i32_0 = arith.constant 0 : i32
    %c0_i32_1 = arith.constant 0 : i32
    return %c0_i32, %c0_i32_0 : i32, i32
  }
  func.func @transform_6(%arg0: i32) -> (i32, i32, i32) {
    %c0_i32 = arith.constant 0 : i32
    %c0_i32_0 = arith.constant 0 : i32
    %c0_i32_1 = arith.constant 0 : i32
    return %arg0, %c0_i32, %c0_i32_0 : i32, i32, i32
  }
  func.func @transform_7(%arg0: i32) -> (i32, i32) {
    %c0_i32 = arith.constant 0 : i32
    %c0_i32_0 = arith.constant 0 : i32
    %c0_i32_1 = arith.constant 0 : i32
    return %c0_i32, %c0_i32_0 : i32, i32
  }
  func.func @transform_8(%arg0: i32) -> (i32, i32) {
    %c0_i32 = arith.constant 0 : i32
    %c0_i32_0 = arith.constant 0 : i32
    %c0_i32_1 = arith.constant 0 : i32
    return %c0_i32, %c0_i32_0 : i32, i32
  }
}

</mosaic_0001>

<bundles_post_ra>
// kernel: tpu_custom_call.1
= control target key start
LH: loop header
LB: loop body
LE: loop exit
PB: predicated region body
PF: predicated region fallthrough
CT: control target
= control target key end

     0   :  { %14 = vsyncpa [#allocation3], 0  ;;  %s4012_s0 = inlined_call_operand.hbm [shape: f32[6,8,512], index: 0, kind: input, shape index: {}]   ;;  %s4013_s1 = inlined_call_operand.hbm [shape: f32[128,512], index: 1, kind: input, shape index: {}]   ;;  %s4014_s2 = inlined_call_operand.hbm [shape: f32[128,128], index: 2, kind: input, shape index: {}]   ;;  %s4015_s3 = inlined_call_operand.vmem [shape: f32[8,128], index: 3, kind: input, shape index: {}]   ;;  %s4016_s4 = inlined_call_operand.hbm [shape: f32[8,128], index: 4, kind: input, shape index: {}]   ;;  %s4017_s5 = inlined_call_operand.vmem [shape: f32[8,128], index: 5, kind: input, shape index: {}]   ;;  %s4018_s6 = inlined_call_operand.hbm [shape: f32[6,8,128], index: 6, kind: output, shape index: {0}]   ;;  %s4019_s7 = inlined_call_operand.hbm [shape: f32[8,128], index: 7, kind: output, shape index: {1}]   ;;  %s4020_s8 = inlined_call_operand.hbm [shape: f32[8,128], index: 8, kind: output, shape index: {2}]  }
   0x1   :  { %15 = vsyncpa [#allocation6], 0 }
   0x2   :  { %16 = vsyncpa [#allocation9], 0 }
   0x3   :  { %17 = vsyncpa [#allocation4], 0 }
   0x4   :  { %18 = vsyncpa [#allocation12], 0  ;;  %s3321_s27 = smov [#allocation5]   ;;  %s3322_s29 = smov [#allocation2]  }
   0x5   :  { %s36_s28 = sshll.u32 %s3321_s27, 4  ;;  %s24_s30 = sshll.u32 %s3322_s29, 4  ;;  %s37_s28 = int_to_ptr.vmem [resolvable:$true] %s36_s28  ;;  %s3380_s30 = int_to_ptr.vmem [resolvable:$true] %s24_s30 }
   0x6   :  { %s3157_s11 = scalar_lea.hbm %s4013_s1, 8192 }
   0x7   :  { %p3158_p0 = scmp.ne.s32.totalorder %s4013_s1, %s3157_s11  ;;  %p3161_p1 = scmp.lt.u32.totalorder %s3157_s11, %s4013_s1 }
   0x9   :  { %p3163_p2 = pnand %p3161_p1, %p3158_p0 }
   0xb   :  { %3166 = shalt.err (!%p3163_p2)
}
   0xc   :  { %s3167_s16 = scalar_lea.vmem %s37_s28, 8192  ;;  %p3172_p4 = scmp.lt.s32.totalorder %s37_s28, %s37_s28 }
   0xd   :  { %p3168_p3 = scmp.ne.s32.totalorder %s37_s28, %s3167_s16  ;;  %p3173_p5 = scmp.lt.s32.totalorder %s3167_s16, %s3167_s16 }
   0xf   :  { %p3174_p6 = por %p3173_p5, %p3172_p4 }
  0x11   :  { %p3175_p7 = pnand %p3174_p6, %p3168_p3 }
  0x13   :  { %3178 = shalt.err (!%p3175_p7)
}
  0x14   :  { %s3323_s17 = smov 512   ;;  %s3324_s18 = smov 32  }
  0x15   :  { %42 = dma.hbm_to_vmem [thread:$0]  %s4013_s1, 8192, %s37_s28, [#allocation6], %s3323_s17, %s3323_s17, %s3324_s18  }
  0x16   :  { %s3179_s23 = scalar_lea.hbm %s4012_s0, 3072 }
  0x17   :  { %p3180_p8 = scmp.ne.s32.totalorder %s4012_s0, %s3179_s23  ;;  %p3183_p9 = scmp.lt.u32.totalorder %s3179_s23, %s4012_s0 }
  0x19   :  { %p3185_p10 = pnand %p3183_p9, %p3180_p8 }
  0x1b   :  { %3188 = shalt.err (!%p3185_p10)
}
  0x1c   :  { %s3189_s29 = scalar_lea.vmem %s3380_s30, 3072  ;;  %p3194_p12 = scmp.lt.s32.totalorder %s3380_s30, %s3380_s30 }
  0x1d   :  { %p3190_p11 = scmp.ne.s32.totalorder %s3380_s30, %s3189_s29  ;;  %p3195_p13 = scmp.lt.s32.totalorder %s3189_s29, %s3189_s29 }
  0x1f   :  { %p3196_p0 = por %p3195_p13, %p3194_p12 }
  0x21   :  { %p3197_p1 = pnand %p3196_p0, %p3190_p11 }
  0x23   :  { %3200 = shalt.err (!%p3197_p1)
}
  0x24   :  { %30 = dma.hbm_to_vmem [thread:$0]  %s4012_s0, 3072, %s3380_s30, [#allocation3], %s3323_s17, %s3323_s17, %s3324_s18  }
  0x25   :  { %s3325_s9 = smov [#allocation7]   ;;  %s3201_s13 = scalar_lea.hbm %s4014_s2, 2048 }
  0x26   :  { %s48_s10 = sshll.u32 %s3325_s9, 4  ;;  %p3202_p2 = scmp.ne.s32.totalorder %s4014_s2, %s3201_s13  ;;  %s49_s10 = int_to_ptr.vmem [resolvable:$true] %s48_s10 }
  0x27   :  { %p3205_p3 = scmp.lt.u32.totalorder %s3201_s13, %s4014_s2 }
  0x29   :  { %p3207_p4 = pnand %p3205_p3, %p3202_p2 }
  0x2b   :  { %3210 = shalt.err (!%p3207_p4)
}
  0x2c   :  { %s3211_s20 = scalar_lea.vmem %s49_s10, 2048  ;;  %p3216_p6 = scmp.lt.s32.totalorder %s49_s10, %s49_s10 }
  0x2d   :  { %p3212_p5 = scmp.ne.s32.totalorder %s49_s10, %s3211_s20  ;;  %p3217_p7 = scmp.lt.s32.totalorder %s3211_s20, %s3211_s20 }
  0x2f   :  { %p3218_p8 = por %p3217_p7, %p3216_p6 }
  0x31   :  { %p3219_p9 = pnand %p3218_p8, %p3212_p5 }
  0x33   :  { %3222 = shalt.err (!%p3219_p9)
}
  0x34   :  { %s3326_s0 = smov 128   ;;  %s3327_s30 = smov 8  }
  0x35   :  { %54 = dma.hbm_to_vmem [thread:$0]  %s4014_s2, 2048, %s49_s10, [#allocation6], %s3326_s0, %s3326_s0, %s3327_s30  }
  0x36   :  { %s3328_s21 = smov [#allocation8]   ;;  %s3223_s25 = scalar_lea.hbm %s4016_s4, 128 }
  0x37   :  { %s63_s22 = sshll.u32 %s3328_s21, 4  ;;  %p3224_p10 = scmp.ne.s32.totalorder %s4016_s4, %s3223_s25  ;;  %s64_s22 = int_to_ptr.vmem [resolvable:$true] %s63_s22 }
  0x38   :  { %p3227_p11 = scmp.lt.u32.totalorder %s3223_s25, %s4016_s4 }
  0x3a   :  { %p3229_p12 = pnand %p3227_p11, %p3224_p10 }
  0x3c   :  { %3232 = shalt.err (!%p3229_p12)
}
  0x3d   :  { %s3233_s28 = scalar_lea.vmem %s64_s22, 128  ;;  %p3238_p0 = scmp.lt.s32.totalorder %s64_s22, %s64_s22 }
  0x3e   :  { %p3234_p13 = scmp.ne.s32.totalorder %s64_s22, %s3233_s28  ;;  %p3239_p1 = scmp.lt.s32.totalorder %s3233_s28, %s3233_s28 }
  0x40   :  { %p3240_p2 = por %p3239_p1, %p3238_p0 }
  0x42   :  { %p3241_p3 = pnand %p3240_p2, %p3234_p13 }
  0x44   :  { %3244 = shalt.err (!%p3241_p3)
}
  0x45   :  { %66 = dma.hbm_to_vmem [thread:$0]  %s4016_s4, 128, %s64_s22, [#allocation9]  }
  0x46   :  { %3311 = dma.done.wait [#allocation3], 3072  }
  0x47   :  { %3312 = vsyncadd [#allocation3], 4294964224 }
  0x48   :  { %3313 = dma.done.wait [#allocation6], 10240  }
  0x49   :  { %3314 = vsyncadd [#allocation6], 4294957056 }
  0x4a   :  { %3315 = dma.done.wait [#allocation9], 128  }
  0x4b   :  { %3316 = vsyncadd [#allocation9], 4294967168  ;;  %v3329_v0 = vmov 0.0   ;;  %v96_v1 = vld [vmem:[#allocation5 + $0x8] sm:$0xff]  ;;  %v95_v3 = vld [vmem:[#allocation5] sm:$0xff]  ;;  %vm3331_vm0 = vmmov 0  }
  0x4c   :  { %223 = vmatprep.mubr.f32.mxu0 %v3329_v0  ;;  %294 = vmatprep.mubr.f32.mxu1 %v3329_v0  ;;  %v100_v2 = vld [vmem:[#allocation5 + $0x28] sm:$0xff]  ;;  %v99_v5 = vld [vmem:[#allocation5 + $0x20] sm:$0xff]  ;;  %v98_v19 = vld [vmem:[#allocation5 + $0x18] sm:$0xff] }
  0x4d   :  { %v3440_v4 = vpack.c.bf16 %v100_v2, %v96_v1  ;;  %v104_v6 = vld [vmem:[#allocation5 + $0x48] sm:$0xff]  ;;  %v3442_v8 = vpack.c.bf16 %v99_v5, %v95_v3  ;;  %v103_v10 = vld [vmem:[#allocation5 + $0x40] sm:$0xff]  ;;  %v102_v20 = vld [vmem:[#allocation5 + $0x38] sm:$0xff] }
  0x4e   :  { %v108_v7 = vld [vmem:[#allocation5 + $0x68] sm:$0xff]  ;;  %v107_v11 = vld [vmem:[#allocation5 + $0x60] sm:$0xff]  ;;  %v3453_v22 = vpack.c.bf16 %v102_v20, %v98_v19  ;;  %v97_v23 = vld [vmem:[#allocation5 + $0x10] sm:$0xff] }
  0x4f   :  { %v3444_v9 = vpack.c.bf16 %v108_v7, %v104_v6  ;;  %v112_v12 = vld [vmem:[#allocation5 + $0x88] sm:$0xff]  ;;  %2496 = vmatprep.subr.bf16.mxu0 %v3440_v4  ;;  %v3448_v14 = vpack.c.bf16 %v107_v11, %v103_v10  ;;  %v111_v15 = vld [vmem:[#allocation5 + $0x80] sm:$0xff]  ;;  %v101_v24 = vld [vmem:[#allocation5 + $0x30] sm:$0xff] }
  0x50   :  { %v116_v13 = vld [vmem:[#allocation5 + $0xa8] sm:$0xff]  ;;  %2498 = vmatpush1.bf16.msra.mxu0 %v3442_v8  ;;  %v115_v16 = vld [vmem:[#allocation5 + $0xa0] sm:$0xff]  ;;  %v3455_v25 = vpack.c.bf16 %v101_v24, %v97_v23  ;;  %2528 = vmatprep.subr.bf16.mxu1 %v3453_v22  ;;  %v106_v27 = vld [vmem:[#allocation5 + $0x58] sm:$0xff] }
  0x51   :  { %2500 = vmatprep.subr.bf16.mxu0 %v3444_v9  ;;  %v3451_v17 = vpack.c.bf16 %v116_v13, %v112_v12  ;;  %v120_v18 = vld [vmem:[#allocation5 + $0xc8] sm:$0xff]  ;;  %v3458_v26 = vpack.c.bf16 %v115_v16, %v111_v15  ;;  %v110_v28 = vld [vmem:[#allocation5 + $0x78] sm:$0xff]  ;;  %v105_v29 = vld [vmem:[#allocation5 + $0x50] sm:$0xff] }
  0x52   :  { %v124_v21 = vld [vmem:[#allocation5 + $0xe8] sm:$0xff]  ;;  %v119_v31 = vld [vmem:[#allocation5 + $0xc0] sm:$0xff]  ;;  %2530 = vmatpush1.bf16.msra.mxu1 %v3455_v25  ;;  %v3465_v33 = vpack.c.bf16 %v110_v28, %v106_v27  ;;  %v109_v34 = vld [vmem:[#allocation5 + $0x70] sm:$0xff] }
  0x53   :  { %v3462_v30 = vpack.c.bf16 %v124_v21, %v120_v18  ;;  %v123_v32 = vld [vmem:[#allocation5 + $0xe0] sm:$0xff]  ;;  %v128_v35 = vld [vmem:[#allocation5 + $0x108] sm:$0xff]  ;;  %v3467_v37 = vpack.c.bf16 %v109_v34, %v105_v29  ;;  %v114_v38 = vld [vmem:[#allocation5 + $0x98] sm:$0xff] }
  0x54   :  { %2502 = vmatpush1.bf16.msra.mxu0 %v3448_v14  ;;  %v132_v36 = vld [vmem:[#allocation5 + $0x128] sm:$0xff]  ;;  %2532 = vmatprep.subr.bf16.mxu1 %v3465_v33  ;;  %v118_v39 = vld [vmem:[#allocation5 + $0xb8] sm:$0xff]  ;;  %v113_v40 = vld [vmem:[#allocation5 + $0x90] sm:$0xff]  ;;  %v3471_v42 = vpack.c.bf16 %v123_v32, %v119_v31 }
  0x55   :  { %2504 = vmatprep.subr.bf16.mxu0 %v3451_v17  ;;  %v117_v41 = vld [vmem:[#allocation5 + $0xb0] sm:$0xff]  ;;  %v127_v43 = vld [vmem:[#allocation5 + $0x100] sm:$0xff]  ;;  %v3473_v45 = vpack.c.bf16 %v118_v39, %v114_v38  ;;  %v3476_v46 = vpack.c.bf16 %v132_v36, %v128_v35  ;;  %v136_v47 = vld [vmem:[#allocation5 + $0x148] sm:$0xff] }
  0x56   :  { %v131_v44 = vld [vmem:[#allocation5 + $0x120] sm:$0xff]  ;;  %2534 = vmatpush1.bf16.msra.mxu1 %v3467_v37  ;;  %v3479_v48 = vpack.c.bf16 %v117_v41, %v113_v40  ;;  %v122_v49 = vld [vmem:[#allocation5 + $0xd8] sm:$0xff]  ;;  %v140_v51 = vld [vmem:[#allocation5 + $0x168] sm:$0xff] }
  0x57   :  { %v126_v50 = vld [vmem:[#allocation5 + $0xf8] sm:$0xff]  ;;  %2536 = vmatprep.subr.bf16.mxu1 %v3473_v45  ;;  %v121_v53 = vld [vmem:[#allocation5 + $0xd0] sm:$0xff]  ;;  %v3485_v55 = vpack.c.bf16 %v131_v44, %v127_v43  ;;  %v3488_v58 = vpack.c.bf16 %v140_v51, %v136_v47  ;;  %v135_v59 = vld [vmem:[#allocation5 + $0x140] sm:$0xff] }
  0x58   :  { %2506 = vmatpush1.bf16.msra.mxu0 %v3458_v26  ;;  %v3482_v52 = vpack.c.bf16 %v126_v50, %v122_v49  ;;  %v125_v54 = vld [vmem:[#allocation5 + $0xf0] sm:$0xff]  ;;  %v130_v56 = vld [vmem:[#allocation5 + $0x118] sm:$0xff]  ;;  %v139_v60 = vld [vmem:[#allocation5 + $0x160] sm:$0xff] }
  0x59   :  { %2508 = vmatprep.subr.bf16.mxu0 %v3462_v30  ;;  %v134_v57 = vld [vmem:[#allocation5 + $0x138] sm:$0xff]  ;;  %v144_v61 = vld [vmem:[#allocation5 + $0x188] sm:$0xff]  ;;  %v3491_v62 = vpack.c.bf16 %v125_v54, %v121_v53  ;;  %v129_v2 = vld [vmem:[#allocation5 + $0x110] sm:$0xff]  ;;  %v3497_v7 = vpack.c.bf16 %v139_v60, %v135_v59  ;;  %v4021_v54 = vmov 0.0|0.0  }
  0x5a   :  { %2538 = vmatpush1.bf16.msra.mxu1 %v3479_v48  ;;  %v148_v63 = vld [vmem:[#allocation5 + $0x1a8] sm:$0xff]  ;;  %v3494_v1 = vpack.c.bf16 %v134_v57, %v130_v56  ;;  %v133_v3 = vld [vmem:[#allocation5 + $0x130] sm:$0xff]  ;;  %v138_v5 = vld [vmem:[#allocation5 + $0x158] sm:$0xff] }
  0x5b   :  { %2540 = vmatprep.subr.bf16.mxu1 %v3482_v52  ;;  %v142_v6 = vld [vmem:[#allocation5 + $0x178] sm:$0xff]  ;;  %v3500_v10 = vpack.c.bf16 %v148_v63, %v144_v61  ;;  %v143_v11 = vld [vmem:[#allocation5 + $0x180] sm:$0xff]  ;;  %v152_v13 = vld [vmem:[#allocation5 + $0x1c8] sm:$0xff]  ;;  %v3503_v15 = vpack.c.bf16 %v133_v3, %v129_v2 }
  0x5c   :  { %2510 = vmatpush1.bf16.msra.mxu0 %v3471_v42  ;;  %v147_v12 = vld [vmem:[#allocation5 + $0x1a0] sm:$0xff]  ;;  %v156_v16 = vld [vmem:[#allocation5 + $0x1e8] sm:$0xff]  ;;  %v3506_v18 = vpack.c.bf16 %v142_v6, %v138_v5  ;;  %v137_v19 = vld [vmem:[#allocation5 + $0x150] sm:$0xff] }
  0x5d   :  { %2512 = vmatprep.subr.bf16.mxu0 %v3476_v46  ;;  %v141_v20 = vld [vmem:[#allocation5 + $0x170] sm:$0xff]  ;;  %v146_v21 = vld [vmem:[#allocation5 + $0x198] sm:$0xff]  ;;  %v3509_v24 = vpack.c.bf16 %v147_v12, %v143_v11  ;;  %v3512_v27 = vpack.c.bf16 %v156_v16, %v152_v13  ;;  %v151_v28 = vld [vmem:[#allocation5 + $0x1c0] sm:$0xff] }
  0x5e   :  { %2542 = vmatpush1.bf16.msra.mxu1 %v3491_v62  ;;  %v150_v23 = vld [vmem:[#allocation5 + $0x1b8] sm:$0xff]  ;;  %v155_v29 = vld [vmem:[#allocation5 + $0x1e0] sm:$0xff]  ;;  %v3515_v31 = vpack.c.bf16 %v141_v20, %v137_v19  ;;  %v145_v34 = vld [vmem:[#allocation5 + $0x190] sm:$0xff] }
  0x5f   :  { %2544 = vmatprep.subr.bf16.mxu1 %v3494_v1  ;;  %v3518_v32 = vpack.c.bf16 %v150_v23, %v146_v21  ;;  %v149_v35 = vld [vmem:[#allocation5 + $0x1b0] sm:$0xff]  ;;  %v154_v36 = vld [vmem:[#allocation5 + $0x1d8] sm:$0xff]  ;;  %v3521_v39 = vpack.c.bf16 %v155_v29, %v151_v28  ;;  %v85_v47 = vld [vmem:[#allocation8] sm:$0xff] }
  0x60   :  { %2514 = vmatpush1.bf16.msra.mxu0 %v3485_v55  ;;  %v158_v38 = vld [vmem:[#allocation5 + $0x1f8] sm:$0xff]  ;;  %v3525_v40 = vpack.c.bf16 %v149_v35, %v145_v34  ;;  %v153_v43 = vld [vmem:[#allocation5 + $0x1d0] sm:$0xff]  ;;  %v329_v50 = vld [vmem:[#allocation7] sm:$0xff] }
  0x61   :  { %2516 = vmatprep.subr.bf16.mxu0 %v3488_v58  ;;  %v3528_v41 = vpack.c.bf16 %v158_v38, %v154_v36  ;;  %v157_v44 = vld [vmem:[#allocation5 + $0x1f0] sm:$0xff]  ;;  %v330_v51 = vld [vmem:[#allocation7 + $0x8] sm:$0xff]  ;;  %v332_v57 = vld [vmem:[#allocation7 + $0x18] sm:$0xff] }
  0x62   :  { %2546 = vmatpush1.bf16.msra.mxu1 %v3503_v15  ;;  %v3532_v49 = vpack.c.bf16 %v157_v44, %v153_v43  ;;  %v3553_v53 = vpack.c.bf16 %v330_v51, %v329_v50  ;;  %v331_v56 = vld [vmem:[#allocation7 + $0x10] sm:$0xff]  ;;  %v333_v60 = vld [vmem:[#allocation7 + $0x20] sm:$0xff]  ;;  %v334_v61 = vld [vmem:[#allocation7 + $0x28] sm:$0xff] }
  0x63   :  { %2548 = vmatprep.subr.bf16.mxu1 %v3506_v18  ;;  %v3559_v59 = vpack.c.bf16 %v332_v57, %v331_v56  ;;  %v3563_v63 = vpack.c.bf16 %v334_v61, %v333_v60  ;;  %v335_v2 = vld [vmem:[#allocation7 + $0x30] sm:$0xff]  ;;  %v336_v3 = vld [vmem:[#allocation7 + $0x38] sm:$0xff]  ;;  %v337_v6 = vld [vmem:[#allocation7 + $0x40] sm:$0xff] }
  0x64   :  { %2518 = vmatpush1.bf16.msra.mxu0 %v3497_v7  ;;  %v3567_v5 = vpack.c.bf16 %v336_v3, %v335_v2  ;;  %v338_v11 = vld [vmem:[#allocation7 + $0x48] sm:$0xff]  ;;  %v339_v13 = vld [vmem:[#allocation7 + $0x50] sm:$0xff]  ;;  %v340_v16 = vld [vmem:[#allocation7 + $0x58] sm:$0xff] }
  0x65   :  { %2520 = vmatprep.subr.bf16.mxu0 %v3500_v10  ;;  %v3571_v12 = vpack.c.bf16 %v338_v11, %v337_v6  ;;  %v3575_v19 = vpack.c.bf16 %v340_v16, %v339_v13  ;;  %v341_v20 = vld [vmem:[#allocation7 + $0x60] sm:$0xff]  ;;  %v342_v21 = vld [vmem:[#allocation7 + $0x68] sm:$0xff]  ;;  %v343_v28 = vld [vmem:[#allocation7 + $0x70] sm:$0xff] }
  0x66   :  { %2550 = vmatpush1.bf16.msra.mxu1 %v3515_v31  ;;  %v3578_v23 = vpack.c.bf16 %v342_v21, %v341_v20  ;;  %v344_v29 = vld [vmem:[#allocation7 + $0x78] sm:$0xff]  ;;  %v91_v35 = vld [vmem:[#allocation2] sm:$0xff]  ;;  %v92_v36 = vld [vmem:[#allocation2 + $0x8] sm:$0xff] }
  0x67   :  { %2552 = vmatprep.subr.bf16.mxu1 %v3518_v32  ;;  %v3584_v34 = vpack.c.bf16 %v344_v29, %v343_v28  ;;  %v94_v56 = vld [vmem:[#allocation2 + $0x18] sm:$0xff]  ;;  %v93_v2 = vld [vmem:[#allocation2 + $0x10] sm:$0xff]  ;;  %v87_v29 = vld [vmem:[%s4017_s5] sm:$0xff] }
  0x68   :  { %2522 = vmatpush1.bf16.msra.mxu0 %v3509_v24 }
  0x69   :  { %2524 = vmatprep.subr.bf16.mxu0 %v3512_v27 }
  0x6a   :  { %2554 = vmatpush1.bf16.msra.mxu1 %v3525_v40 }
  0x6b   :  { %2556 = vmatprep.subr.bf16.mxu1 %v3528_v41 }
  0x6c   :  { %2526 = vmatpush1.bf16.msra.mxu0 %v3521_v39 }
  0x6d   :  { %2559 = vmatprep.subr.bf16.mxu0 %v4021_v54 }
  0x6e   :  { %2558 = vmatpush1.bf16.msra.mxu1 %v3532_v49 }
  0x6f   :  { %224 = vmatmul.mubr.f32.vlgmr.msra.gmra.mrb[0].mxu0 %v85_v47  ;;  %2584 = vmatprep.subr.bf16.mxu1 %v3440_v4 }
  0x70   :  { %2561 = vmatpush3.bf16.msra.mxu0 %v3553_v53  ;;  %2317 = vmatprep.mubr.msk.f32.mxu0 %vm3331_vm0, %v3329_v0 }
  0x71   :  { %295 = vmatmul.mubr.f32.vlgmr.msra.gmra.mrb[0].mxu1 %v85_v47  ;;  %2562 = vmatprep.subr.bf16.mxu0 %v4021_v54 }
  0x72   :  { %2586 = vmatpush1.bf16.msra.mxu1 %v3442_v8  ;;  %560 = vmatprep.mubr.f32.mxu1 %v3329_v0 }
  0x73   :  { %2588 = vmatprep.subr.bf16.mxu1 %v3444_v9 }
  0x74   :  { %2564 = vmatpush3.bf16.msra.mxu0 %v3559_v59 }
  0x75   :  { %2565 = vmatprep.subr.bf16.mxu0 %v4021_v54 }
  0x76   :  { %2590 = vmatpush1.bf16.msra.mxu1 %v3448_v14 }
  0x77   :  { %2592 = vmatprep.subr.bf16.mxu1 %v3451_v17 }
  0x78   :  { %2567 = vmatpush3.bf16.msra.mxu0 %v3563_v63 }
  0x79   :  { %2568 = vmatprep.subr.bf16.mxu0 %v4021_v54 }
  0x7a   :  { %2594 = vmatpush1.bf16.msra.mxu1 %v3458_v26 }
  0x7b   :  { %2596 = vmatprep.subr.bf16.mxu1 %v3462_v30 }
  0x7c   :  { %2570 = vmatpush3.bf16.msra.mxu0 %v3567_v5 }
  0x7d   :  { %2571 = vmatprep.subr.bf16.mxu0 %v4021_v54 }
  0x7e   :  { %2598 = vmatpush1.bf16.msra.mxu1 %v3471_v42 }
  0x7f   :  { %2600 = vmatprep.subr.bf16.mxu1 %v3476_v46 }
  0x80   :  { %2573 = vmatpush3.bf16.msra.mxu0 %v3571_v12 }
  0x81   :  { %2574 = vmatprep.subr.bf16.mxu0 %v4021_v54 }
  0x82   :  { %2602 = vmatpush1.bf16.msra.mxu1 %v3485_v55 }
  0x83   :  { %2604 = vmatprep.subr.bf16.mxu1 %v3488_v58 }
  0x84   :  { %2576 = vmatpush3.bf16.msra.mxu0 %v3575_v19 }
  0x85   :  { %2577 = vmatprep.subr.bf16.mxu0 %v4021_v54 }
  0x86   :  { %2606 = vmatpush1.bf16.msra.mxu1 %v3497_v7 }
  0x87   :  { %2608 = vmatprep.subr.bf16.mxu1 %v3500_v10 }
  0x88   :  { %2579 = vmatpush3.bf16.msra.mxu0 %v3578_v23 }
  0x89   :  { %2580 = vmatprep.subr.bf16.mxu0 %v4021_v54 }
  0x8a   :  { %2610 = vmatpush1.bf16.msra.mxu1 %v3509_v24 }
  0x8b   :  { %2612 = vmatprep.subr.bf16.mxu1 %v3512_v27 }
  0x8c   :  { %2582 = vmatpush3.bf16.msra.mxu0 %v3584_v34 }
  0x8d   :  { %2616 = vmatprep.subr.bf16.mxu0 %v3453_v22 }
  0x8e   :  { %2614 = vmatpush1.bf16.msra.mxu1 %v3521_v39 }
  0x8f   :  { %2647 = vmatprep.subr.bf16.mxu1 %v4021_v54 }
 0x142   :  { %v225_v38 = vpop.f32.mrb[0].mxu0 }
 0x143   :  { %v301_v43 = vadd.f32 %v225_v38, %v91_v35  ;;  %v227_v44 = vpop.f32.mrb[1].mxu0 }
 0x144   :  { %v302_v47 = vadd.f32 %v227_v44, %v92_v36  ;;  %v296_v57 = vpop.f32.mrb[0].mxu1 }
 0x145   :  { %v2165_v50 = vmul.f32 -1.442695, %v301_v43  ;;  %v298_v60 = vpop.f32.mrb[1].mxu1  ;;  %v303_v6 = vadd.f32 %v296_v57, %v93_v2  ;;  %v431_v57 = vld [vmem:[#allocation2 + $0x38] sm:$0xff] }
 0x146   :  { %v2166_v51 = vmul.f32 -1.442695, %v302_v47  ;;  %v304_v61 = vadd.f32 %v298_v60, %v94_v56 }
 0x147   :  { %3037 = vpow2.f32 %v2165_v50 }
 0x148   :  { %3039 = vpow2.f32 %v2166_v51  ;;  %v2167_v3 = vmul.f32 -1.442695, %v304_v61 }
 0x14a   :  { %3041 = vpow2.f32 %v2167_v3 }
 0x14b   :  { %3043 = vtanh.f32 %v303_v6 }
 0x151   :  { %v3038_v11 = vpop.eup %3037 }
 0x152   :  { %v3040_v13 = vpop.eup %3039  ;;  %v308_v16 = vadd.f32 1.0, %v3038_v11 }
 0x153   :  { %v314_v20 = vadd.f32 1.0, %v3040_v13 }
 0x154   :  { %3045 = vrcp.f32 %v308_v16  ;;  %v3042_v21 = vpop.eup %3041 }
 0x155   :  { %3047 = vrcp.f32 %v314_v20  ;;  %v3044_v28 = vpop.eup %3043  ;;  %v321_v36 = vadd.f32 1.0, %v3042_v21 }
 0x157   :  { %3049 = vrcp.f32 %v321_v36 }
 0x15e   :  { %v3046_v35 = vpop.eup %3045 }
 0x15f   :  { %v3048_v38 = vpop.eup %3047  ;;  %v325_v43 = vmul.f32 %v3046_v35, %v3044_v28 }
 0x160   :  { %v324_v44 = vmul.f32 %v3048_v38, %v87_v29 }
 0x161   :  { %v3050_v50 = vpop.eup %3049 }
 0x162   :  { %v3592_v47 = vadd.f32 %v325_v43, %v324_v44 }
 0x164   :  { %3051 = vtanh.f32 %v3592_v47 }
 0x16e   :  { %v3052_v51 = vpop.eup %3051 }
 0x16f   :  { %v328_v56 = vmul.f32 %v3052_v51, %v3050_v50  ;;  %v1145_v50 = vld [vmem:[#allocation5 + $0x128] sm:$0xff] }
 0x171   :  { %2318 = vmatmul.mubr.f32.vlgmr.msra.gmra.mrb[2].mxu0 %v328_v56  ;;  %561 = vmatmul.mubr.f32.vlgmr.msra.gmra.mrb[2].mxu1 %v328_v56 }
 0x172   :  { %2618 = vmatpush1.bf16.msra.mxu0 %v3455_v25  ;;  %631 = vmatprep.mubr.f32.mxu0 %v3329_v0 }
 0x173   :  { %2620 = vmatprep.subr.bf16.mxu0 %v3465_v33  ;;  %2649 = vmatpush3.bf16.msra.mxu1 %v3553_v53 }
 0x174   :  { %2650 = vmatprep.subr.bf16.mxu1 %v4021_v54  ;;  %2352 = vmatprep.mubr.msk.f32.mxu1 %vm3331_vm0, %v3329_v0 }
 0x176   :  { %2622 = vmatpush1.bf16.msra.mxu0 %v3467_v37 }
 0x177   :  { %2624 = vmatprep.subr.bf16.mxu0 %v3473_v45  ;;  %2652 = vmatpush3.bf16.msra.mxu1 %v3559_v59 }
 0x178   :  { %2653 = vmatprep.subr.bf16.mxu1 %v4021_v54 }
 0x17a   :  { %2626 = vmatpush1.bf16.msra.mxu0 %v3479_v48 }
 0x17b   :  { %2628 = vmatprep.subr.bf16.mxu0 %v3482_v52  ;;  %2655 = vmatpush3.bf16.msra.mxu1 %v3563_v63 }
 0x17c   :  { %2656 = vmatprep.subr.bf16.mxu1 %v4021_v54 }
 0x17e   :  { %2630 = vmatpush1.bf16.msra.mxu0 %v3491_v62 }
 0x17f   :  { %2632 = vmatprep.subr.bf16.mxu0 %v3494_v1  ;;  %2658 = vmatpush3.bf16.msra.mxu1 %v3567_v5 }
 0x180   :  { %2659 = vmatprep.subr.bf16.mxu1 %v4021_v54 }
 0x182   :  { %2634 = vmatpush1.bf16.msra.mxu0 %v3503_v15 }
 0x183   :  { %2636 = vmatprep.subr.bf16.mxu0 %v3506_v18  ;;  %2661 = vmatpush3.bf16.msra.mxu1 %v3571_v12 }
 0x184   :  { %2662 = vmatprep.subr.bf16.mxu1 %v4021_v54 }
 0x186   :  { %2638 = vmatpush1.bf16.msra.mxu0 %v3515_v31 }
 0x187   :  { %2640 = vmatprep.subr.bf16.mxu0 %v3518_v32  ;;  %2664 = vmatpush3.bf16.msra.mxu1 %v3575_v19 }
 0x188   :  { %2665 = vmatprep.subr.bf16.mxu1 %v4021_v54 }
 0x18a   :  { %2642 = vmatpush1.bf16.msra.mxu0 %v3525_v40 }
 0x18b   :  { %2644 = vmatprep.subr.bf16.mxu0 %v3528_v41  ;;  %2667 = vmatpush3.bf16.msra.mxu1 %v3578_v23 }
 0x18c   :  { %2668 = vmatprep.subr.bf16.mxu1 %v4021_v54 }
 0x18e   :  { %2646 = vmatpush1.bf16.msra.mxu0 %v3532_v49 }
 0x18f   :  { %2672 = vmatprep.subr.bf16.mxu0 %v3440_v4  ;;  %2670 = vmatpush3.bf16.msra.mxu1 %v3584_v34  ;;  %v3650_v4 = vld [vmem:[%s4015_s3] sm:$0xff] }
 0x190   :  { %2704 = vmatprep.subr.bf16.mxu1 %v3453_v22 }
 0x191   :  { %632 = vmatmul.mubr.f32.vlgmr.msra.gmra.mrb[4].mxu0 %v328_v56  ;;  %v1140_v56 = vld [vmem:[#allocation5 + $0x100] sm:$0xff] }
 0x192   :  { %2674 = vmatpush1.bf16.msra.mxu0 %v3442_v8  ;;  %898 = vmatprep.mubr.f32.mxu0 %v3329_v0 }
 0x193   :  { %2676 = vmatprep.subr.bf16.mxu0 %v3444_v9 }
 0x196   :  { %2678 = vmatpush1.bf16.msra.mxu0 %v3448_v14 }
 0x197   :  { %2680 = vmatprep.subr.bf16.mxu0 %v3451_v17 }
 0x19a   :  { %2682 = vmatpush1.bf16.msra.mxu0 %v3458_v26  ;;  %v429_v26 = vld [vmem:[#allocation2 + $0x28] sm:$0xff] }
 0x19b   :  { %2684 = vmatprep.subr.bf16.mxu0 %v3462_v30  ;;  %v428_v30 = vld [vmem:[#allocation2 + $0x20] sm:$0xff] }
 0x19e   :  { %2686 = vmatpush1.bf16.msra.mxu0 %v3471_v42 }
 0x19f   :  { %2688 = vmatprep.subr.bf16.mxu0 %v3476_v46 }
 0x1a2   :  { %2690 = vmatpush1.bf16.msra.mxu0 %v3485_v55 }
 0x1a3   :  { %2692 = vmatprep.subr.bf16.mxu0 %v3488_v58 }
 0x1a6   :  { %2694 = vmatpush1.bf16.msra.mxu0 %v3497_v7 }
 0x1a7   :  { %2696 = vmatprep.subr.bf16.mxu0 %v3500_v10 }
 0x1aa   :  { %2698 = vmatpush1.bf16.msra.mxu0 %v3509_v24 }
 0x1ab   :  { %2700 = vmatprep.subr.bf16.mxu0 %v3512_v27 }
 0x1ae   :  { %2702 = vmatpush1.bf16.msra.mxu0 %v3521_v39  ;;  %v430_v39 = vld [vmem:[#allocation2 + $0x30] sm:$0xff] }
 0x1af   :  { %2735 = vmatprep.subr.bf16.mxu0 %v4021_v54 }
 0x244   :  { %v412_v8 = vpop.f32.mrb[2].mxu0  ;;  %v562_v9 = vpop.f32.mrb[2].mxu1 }
 0x245   :  { %v3653_v14 = vadd.f32 %v412_v8, %v3650_v4  ;;  %v2319_v17 = vpop.f32.mrb[3].mxu0  ;;  %v564_v22 = vpop.f32.mrb[3].mxu1  ;;  %v638_v46 = vadd.f32 %v562_v9, %v428_v30  ;;  %v1144_v8 = vld [vmem:[#allocation5 + $0x120] sm:$0xff] }
 0x246   :  { %v639_v42 = vadd.f32 %v564_v22, %v429_v26  ;;  %v3720_v9 = vpack.c.bf16 %v1144_v8, %v1140_v56  ;;  %v1149_v17 = vld [vmem:[#allocation5 + $0x148] sm:$0xff]  ;;  %v1148_v30 = vld [vmem:[#allocation5 + $0x140] sm:$0xff] }
 0x247   :  { %416 = vmax.xlane.f32.xlu0 %v3653_v14  ;;  %v2168_v58 = vmul.f32 -1.442695, %v638_v46  ;;  %v1153_v22 = vld [vmem:[#allocation5 + $0x168] sm:$0xff] }
 0x248   :  { %v2169_v55 = vmul.f32 -1.442695, %v639_v42  ;;  %v3724_v26 = vpack.c.bf16 %v1153_v22, %v1149_v17  ;;  %v1152_v42 = vld [vmem:[#allocation5 + $0x160] sm:$0xff] }
 0x249   :  { %v3726_v46 = vpack.c.bf16 %v1152_v42, %v1148_v30  ;;  %v1110_v30 = vld [vmem:[#allocation5 + $0x10] sm:$0xff] }
 0x24a   :  { %3053 = vpow2.f32 %v2169_v55  ;;  %v1157_v55 = vld [vmem:[#allocation5 + $0x188] sm:$0xff]  ;;  %v1114_v42 = vld [vmem:[#allocation5 + $0x30] sm:$0xff] }
 0x24b   :  { %3055 = vpow2.f32 %v2168_v58  ;;  %v1161_v58 = vld [vmem:[#allocation5 + $0x1a8] sm:$0xff] }
 0x254   :  { %v3054_v7 = vpop.eup %3053 }
 0x255   :  { %v3056_v10 = vpop.eup %3055  ;;  %v651_v24 = vadd.f32 1.0, %v3054_v7  ;;  %v1156_v7 = vld [vmem:[#allocation5 + $0x180] sm:$0xff] }
 0x256   :  { %v645_v27 = vadd.f32 1.0, %v3056_v10  ;;  %v3729_v10 = vpack.c.bf16 %v1161_v58, %v1157_v55  ;;  %v1119_v55 = vld [vmem:[#allocation5 + $0x58] sm:$0xff] }
 0x257   :  { %3057 = vrcp.f32 %v651_v24  ;;  %v1160_v24 = vld [vmem:[#allocation5 + $0x1a0] sm:$0xff]  ;;  %v1123_v58 = vld [vmem:[#allocation5 + $0x78] sm:$0xff] }
 0x258   :  { %3059 = vrcp.f32 %v645_v27  ;;  %v1165_v27 = vld [vmem:[#allocation5 + $0x1c8] sm:$0xff] }
 0x261   :  { %v3058_v11 = vpop.eup %3057 }
 0x262   :  { %v3060_v13 = vpop.eup %3059  ;;  %v661_v20 = vmul.f32 %v3058_v11, %v3592_v47  ;;  %v1141_v47 = vld [vmem:[#allocation5 + $0x108] sm:$0xff] }
 0x263   :  { %v3718_v51 = vpack.c.bf16 %v1145_v50, %v1141_v47 }
 0x264   :  { %v633_v60 = vpop.f32.mrb[4].mxu0 }
 0x265   :  { %v640_v61 = vadd.f32 %v633_v60, %v430_v39  ;;  %v635_v2 = vpop.f32.mrb[5].mxu0  ;;  %v1169_v39 = vld [vmem:[#allocation5 + $0x1e8] sm:$0xff]  ;;  %v1111_v60 = vld [vmem:[#allocation5 + $0x18] sm:$0xff] }
 0x266   :  { %v641_v3 = vadd.f32 %v635_v2, %v431_v57  ;;  %v3732_v57 = vpack.c.bf16 %v1160_v24, %v1156_v7  ;;  %v1164_v2 = vld [vmem:[#allocation5 + $0x1c0] sm:$0xff] }
 0x267   :  { %3061 = vtanh.f32 %v640_v61  ;;  %v3735_v61 = vpack.c.bf16 %v1169_v39, %v1165_v27  ;;  %v3754_v27 = vpack.c.bf16 %v1114_v42, %v1110_v30  ;;  %v1167_v30 = vld [vmem:[#allocation5 + $0x1d8] sm:$0xff] }
 0x268   :  { %v2170_v6 = vmul.f32 -1.442695, %v641_v3  ;;  %v1168_v3 = vld [vmem:[#allocation5 + $0x1e0] sm:$0xff]  ;;  %v1171_v42 = vld [vmem:[#allocation5 + $0x1f8] sm:$0xff] }
 0x26a   :  { %3063 = vpow2.f32 %v2170_v6  ;;  %v1115_v6 = vld [vmem:[#allocation5 + $0x38] sm:$0xff] }
 0x26b   :  { %v3737_v11 = vpack.c.bf16 %v1115_v6, %v1111_v60  ;;  %v3756_v60 = vpack.c.bf16 %v1123_v58, %v1119_v55  ;;  %v1131_v6 = vld [vmem:[#allocation5 + $0xb8] sm:$0xff]  ;;  %v3795_v58 = vpack.c.bf16 %v1171_v42, %v1167_v30 }
 0x26c   :  { %v1357_v30 = vld [vmem:[#allocation7 + $0x78] sm:$0xff] }
 0x271   :  { %v3062_v16 = vpop.eup %3061 }
 0x272   :  { %v662_v21 = vmul.f32 %v3062_v16, %v3060_v13  ;;  %v3740_v13 = vpack.c.bf16 %v1168_v3, %v1164_v2  ;;  %v1122_v2 = vld [vmem:[#allocation5 + $0x70] sm:$0xff]  ;;  %v1127_v3 = vld [vmem:[#allocation5 + $0x98] sm:$0xff] }
 0x274   :  { %v3064_v28 = vpop.eup %3063  ;;  %v3657_v29 = vadd.f32 %v662_v21, %v661_v20 }
 0x275   :  { %v658_v35 = vadd.f32 1.0, %v3064_v28 }
 0x276   :  { %3065 = vtanh.f32 %v3657_v29 }
 0x277   :  { %3067 = vrcp.f32 %v658_v35 }
 0x280   :  { %v3066_v36 = vpop.eup %3065 }
 0x281   :  { %v3068_v38 = vpop.eup %3067 }
 0x282   :  { %v665_v43 = vmul.f32 %v3068_v38, %v3066_v36  ;;  %v767_v36 = vld [vmem:[#allocation2 + $0x48] sm:$0xff]  ;;  %v766_v38 = vld [vmem:[#allocation2 + $0x40] sm:$0xff] }
 0x284   :  { %2353 = vmatmul.mubr.f32.vlgmr.msra.gmra.mrb[4].mxu1 %v665_v43  ;;  %899 = vmatmul.mubr.f32.vlgmr.msra.gmra.mrb[6].mxu0 %v665_v43 }
 0x285   :  { %2706 = vmatpush1.bf16.msra.mxu1 %v3455_v25  ;;  %969 = vmatprep.mubr.f32.mxu1 %v3329_v0  ;;  %v1109_v25 = vld [vmem:[#allocation5 + $0x8] sm:$0xff] }
 0x286   :  { %2708 = vmatprep.subr.bf16.mxu1 %v3465_v33  ;;  %2737 = vmatpush3.bf16.msra.mxu0 %v3553_v53  ;;  %v1113_v33 = vld [vmem:[#allocation5 + $0x28] sm:$0xff]  ;;  %v1124_v53 = vld [vmem:[#allocation5 + $0x80] sm:$0xff] }
 0x287   :  { %2738 = vmatprep.subr.bf16.mxu0 %v4021_v54  ;;  %2387 = vmatprep.mubr.msk.f32.mxu0 %vm3331_vm0, %v3329_v0 }
 0x289   :  { %2710 = vmatpush1.bf16.msra.mxu1 %v3467_v37  ;;  %v3694_v37 = vpack.c.bf16 %v1113_v33, %v1109_v25 }
 0x28a   :  { %2712 = vmatprep.subr.bf16.mxu1 %v3473_v45  ;;  %2740 = vmatpush3.bf16.msra.mxu0 %v3559_v59  ;;  %v1108_v45 = vld [vmem:[#allocation5] sm:$0xff] }
 0x28b   :  { %2741 = vmatprep.subr.bf16.mxu0 %v4021_v54  ;;  %v1128_v59 = vld [vmem:[#allocation5 + $0xa0] sm:$0xff] }
 0x28d   :  { %2714 = vmatpush1.bf16.msra.mxu1 %v3479_v48  ;;  %v1112_v48 = vld [vmem:[#allocation5 + $0x20] sm:$0xff] }
 0x28e   :  { %2716 = vmatprep.subr.bf16.mxu1 %v3482_v52  ;;  %2743 = vmatpush3.bf16.msra.mxu0 %v3563_v63  ;;  %v3696_v52 = vpack.c.bf16 %v1112_v48, %v1108_v45  ;;  %v3708_v63 = vpack.c.bf16 %v1128_v59, %v1124_v53 }
 0x28f   :  { %2744 = vmatprep.subr.bf16.mxu0 %v4021_v54 }
 0x291   :  { %2718 = vmatpush1.bf16.msra.mxu1 %v3491_v62  ;;  %v1117_v62 = vld [vmem:[#allocation5 + $0x48] sm:$0xff] }
 0x292   :  { %2720 = vmatprep.subr.bf16.mxu1 %v3494_v1  ;;  %2746 = vmatpush3.bf16.msra.mxu0 %v3567_v5  ;;  %v1121_v1 = vld [vmem:[#allocation5 + $0x68] sm:$0xff] }
 0x293   :  { %2747 = vmatprep.subr.bf16.mxu0 %v4021_v54  ;;  %v1133_v5 = vld [vmem:[#allocation5 + $0xc8] sm:$0xff] }
 0x295   :  { %2722 = vmatpush1.bf16.msra.mxu1 %v3503_v15  ;;  %v3700_v15 = vpack.c.bf16 %v1121_v1, %v1117_v62 }
 0x296   :  { %2724 = vmatprep.subr.bf16.mxu1 %v3506_v18  ;;  %2749 = vmatpush3.bf16.msra.mxu0 %v3571_v12  ;;  %v1116_v18 = vld [vmem:[#allocation5 + $0x40] sm:$0xff]  ;;  %v1137_v12 = vld [vmem:[#allocation5 + $0xe8] sm:$0xff] }
 0x297   :  { %2750 = vmatprep.subr.bf16.mxu0 %v4021_v54 }
 0x299   :  { %2726 = vmatpush1.bf16.msra.mxu1 %v3515_v31  ;;  %v1120_v31 = vld [vmem:[#allocation5 + $0x60] sm:$0xff] }
 0x29a   :  { %2728 = vmatprep.subr.bf16.mxu1 %v3518_v32  ;;  %2752 = vmatpush3.bf16.msra.mxu0 %v3575_v19  ;;  %v3702_v32 = vpack.c.bf16 %v1120_v31, %v1116_v18  ;;  %v3712_v19 = vpack.c.bf16 %v1137_v12, %v1133_v5  ;;  %v768_v31 = vld [vmem:[#allocation2 + $0x50] sm:$0xff] }
 0x29b   :  { %2753 = vmatprep.subr.bf16.mxu0 %v4021_v54 }
 0x29d   :  { %2730 = vmatpush1.bf16.msra.mxu1 %v3525_v40  ;;  %v1125_v40 = vld [vmem:[#allocation5 + $0x88] sm:$0xff] }
 0x29e   :  { %2732 = vmatprep.subr.bf16.mxu1 %v3528_v41  ;;  %2755 = vmatpush3.bf16.msra.mxu0 %v3578_v23  ;;  %v1129_v41 = vld [vmem:[#allocation5 + $0xa8] sm:$0xff]  ;;  %v1132_v23 = vld [vmem:[#allocation5 + $0xc0] sm:$0xff] }
 0x29f   :  { %2756 = vmatprep.subr.bf16.mxu0 %v4021_v54 }
 0x2a1   :  { %2734 = vmatpush1.bf16.msra.mxu1 %v3532_v49  ;;  %v3706_v49 = vpack.c.bf16 %v1129_v41, %v1125_v40  ;;  %v769_v40 = vld [vmem:[#allocation2 + $0x58] sm:$0xff] }
 0x2a2   :  { %2758 = vmatpush3.bf16.msra.mxu0 %v3584_v34  ;;  %2760 = vmatprep.subr.bf16.mxu1 %v3694_v37  ;;  %v1136_v34 = vld [vmem:[#allocation5 + $0xe0] sm:$0xff] }
 0x2a3   :  { %v3714_v44 = vpack.c.bf16 %v1136_v34, %v1132_v23  ;;  %2792 = vmatprep.subr.bf16.mxu0 %v3737_v11 }
 0x2a4   :  { %970 = vmatmul.mubr.f32.vlgmr.msra.gmra.mrb[6].mxu1 %v665_v43 }
 0x2a5   :  { %1236 = vmatprep.mubr.f32.mxu1 %v3329_v0  ;;  %2762 = vmatpush1.bf16.msra.mxu1 %v3696_v52 }
 0x2a6   :  { %2764 = vmatprep.subr.bf16.mxu1 %v3700_v15 }
 0x2a9   :  { %2766 = vmatpush1.bf16.msra.mxu1 %v3702_v32 }
 0x2aa   :  { %2768 = vmatprep.subr.bf16.mxu1 %v3706_v49 }
 0x2ad   :  { %2770 = vmatpush1.bf16.msra.mxu1 %v3708_v63 }
 0x2ae   :  { %2772 = vmatprep.subr.bf16.mxu1 %v3712_v19 }
 0x2b1   :  { %2774 = vmatpush1.bf16.msra.mxu1 %v3714_v44 }
 0x2b2   :  { %2776 = vmatprep.subr.bf16.mxu1 %v3718_v51 }
 0x2b5   :  { %2778 = vmatpush1.bf16.msra.mxu1 %v3720_v9 }
 0x2b6   :  { %2780 = vmatprep.subr.bf16.mxu1 %v3724_v26 }
 0x2b9   :  { %2782 = vmatpush1.bf16.msra.mxu1 %v3726_v46 }
 0x2ba   :  { %2784 = vmatprep.subr.bf16.mxu1 %v3729_v10 }
 0x2bd   :  { %2786 = vmatpush1.bf16.msra.mxu1 %v3732_v57 }
 0x2be   :  { %2788 = vmatprep.subr.bf16.mxu1 %v3735_v61 }
 0x2c1   :  { %2790 = vmatpush1.bf16.msra.mxu1 %v3740_v13 }
 0x2c2   :  { %2823 = vmatprep.subr.bf16.mxu1 %v4021_v54 }
 0x357   :  { %v749_v16 = vpop.f32.mrb[4].mxu1  ;;  %v900_v20 = vpop.f32.mrb[6].mxu0 }
 0x358   :  { %v3747_v21 = vadd.f32 %v749_v16, %v3650_v4  ;;  %v2354_v28 = vpop.f32.mrb[5].mxu1  ;;  %v902_v35 = vpop.f32.mrb[7].mxu0  ;;  %v976_v25 = vadd.f32 %v900_v20, %v766_v38  ;;  %v3763_v20 = vpack.c.bf16 %v1131_v6, %v1127_v3  ;;  %v1139_v38 = vld [vmem:[#allocation5 + $0xf8] sm:$0xff]  ;;  %v1344_v6 = vld [vmem:[#allocation7 + $0x10] sm:$0xff] }
 0x359   :  { %v977_v43 = vadd.f32 %v902_v35, %v767_v36  ;;  %v1126_v28 = vld [vmem:[#allocation5 + $0x90] sm:$0xff]  ;;  %v1135_v36 = vld [vmem:[#allocation5 + $0xd8] sm:$0xff] }
 0x35a   :  { %753 = vmax.xlane.f32.xlu0 %v3747_v21  ;;  %v2171_v45 = vmul.f32 -1.442695, %v976_v25  ;;  %v1130_v35 = vld [vmem:[#allocation5 + $0xb0] sm:$0xff]  ;;  %v3771_v25 = vpack.c.bf16 %v1139_v38, %v1135_v36  ;;  %v1346_v36 = vld [vmem:[#allocation7 + $0x20] sm:$0xff]  ;;  %v1347_v38 = vld [vmem:[#allocation7 + $0x28] sm:$0xff] }
 0x35b   :  { %v2172_v33 = vmul.f32 -1.442695, %v977_v43  ;;  %v3768_v43 = vpack.c.bf16 %v1130_v35, %v1126_v28  ;;  %v1345_v28 = vld [vmem:[#allocation7 + $0x18] sm:$0xff] }
 0x35c   :  { %v3824_v35 = vpack.c.bf16 %v1345_v28, %v1344_v6  ;;  %v1105_v28 = vld [vmem:[#allocation2 + $0x68] sm:$0xff] }
 0x35d   :  { %3069 = vpow2.f32 %v2172_v33  ;;  %v1134_v33 = vld [vmem:[#allocation5 + $0xd0] sm:$0xff] }
 0x35e   :  { %3071 = vpow2.f32 %v2171_v45  ;;  %v1138_v45 = vld [vmem:[#allocation5 + $0xf0] sm:$0xff] }
 0x367   :  { %v3070_v48 = vpop.eup %3069 }
 0x368   :  { %v3072_v62 = vpop.eup %3071  ;;  %v989_v1 = vadd.f32 1.0, %v3070_v48  ;;  %v1143_v48 = vld [vmem:[#allocation5 + $0x118] sm:$0xff] }
 0x369   :  { %v983_v18 = vadd.f32 1.0, %v3072_v62  ;;  %v1147_v62 = vld [vmem:[#allocation5 + $0x138] sm:$0xff] }
 0x36a   :  { %3073 = vrcp.f32 %v989_v1  ;;  %v3774_v1 = vpack.c.bf16 %v1138_v45, %v1134_v33  ;;  %v3828_v33 = vpack.c.bf16 %v1347_v38, %v1346_v36  ;;  %v1348_v45 = vld [vmem:[#allocation7 + $0x30] sm:$0xff]  ;;  %v1104_v36 = vld [vmem:[#allocation2 + $0x60] sm:$0xff] }
 0x36b   :  { %3075 = vrcp.f32 %v983_v18  ;;  %v3777_v18 = vpack.c.bf16 %v1147_v62, %v1143_v48  ;;  %v1349_v48 = vld [vmem:[#allocation7 + $0x38] sm:$0xff] }
 0x36c   :  { %v3832_v62 = vpack.c.bf16 %v1349_v48, %v1348_v45 }
 0x374   :  { %v3074_v23 = vpop.eup %3073 }
 0x375   :  { %v3076_v34 = vpop.eup %3075  ;;  %v999_v50 = vmul.f32 %v3074_v23, %v3657_v29  ;;  %v1118_v29 = vld [vmem:[#allocation5 + $0x50] sm:$0xff] }
 0x376   :  { %v3759_v16 = vpack.c.bf16 %v1122_v2, %v1118_v29  ;;  %v1154_v23 = vld [vmem:[#allocation5 + $0x170] sm:$0xff]  ;;  %v1343_v2 = vld [vmem:[#allocation7 + $0x8] sm:$0xff] }
 0x377   :  { %v971_v41 = vpop.f32.mrb[6].mxu1 }
 0x378   :  { %v978_v53 = vadd.f32 %v971_v41, %v768_v31  ;;  %v973_v59 = vpop.f32.mrb[7].mxu1  ;;  %v1142_v31 = vld [vmem:[#allocation5 + $0x110] sm:$0xff]  ;;  %v1151_v41 = vld [vmem:[#allocation5 + $0x158] sm:$0xff] }
 0x379   :  { %v979_v5 = vadd.f32 %v973_v59, %v769_v40  ;;  %v1146_v40 = vld [vmem:[#allocation5 + $0x130] sm:$0xff] }
 0x37a   :  { %3077 = vtanh.f32 %v978_v53  ;;  %v1155_v53 = vld [vmem:[#allocation5 + $0x178] sm:$0xff]  ;;  %v3780_v59 = vpack.c.bf16 %v1146_v40, %v1142_v31  ;;  %v1350_v31 = vld [vmem:[#allocation7 + $0x40] sm:$0xff]  ;;  %v1351_v40 = vld [vmem:[#allocation7 + $0x48] sm:$0xff] }
 0x37b   :  { %v2173_v12 = vmul.f32 -1.442695, %v979_v5  ;;  %v3783_v5 = vpack.c.bf16 %v1155_v53, %v1151_v41  ;;  %v3836_v41 = vpack.c.bf16 %v1351_v40, %v1350_v31  ;;  %v1352_v53 = vld [vmem:[#allocation7 + $0x50] sm:$0xff] }
 0x37d   :  { %3079 = vpow2.f32 %v2173_v12  ;;  %v1150_v12 = vld [vmem:[#allocation5 + $0x150] sm:$0xff] }
 0x384   :  { %v3078_v47 = vpop.eup %3077 }
 0x385   :  { %v1000_v56 = vmul.f32 %v3078_v47, %v3076_v34  ;;  %v1159_v34 = vld [vmem:[#allocation5 + $0x198] sm:$0xff] }
 0x386   :  { %v1163_v47 = vld [vmem:[#allocation5 + $0x1b8] sm:$0xff] }
 0x387   :  { %v3080_v8 = vpop.eup %3079  ;;  %v3751_v17 = vadd.f32 %v1000_v56, %v999_v50  ;;  %v3786_v50 = vpack.c.bf16 %v1154_v23, %v1150_v12  ;;  %v3789_v56 = vpack.c.bf16 %v1163_v47, %v1159_v34  ;;  %v1353_v12 = vld [vmem:[#allocation7 + $0x58] sm:$0xff]  ;;  %v1354_v34 = vld [vmem:[#allocation7 + $0x60] sm:$0xff]  ;;  %v1355_v47 = vld [vmem:[#allocation7 + $0x68] sm:$0xff] }
 0x388   :  { %v996_v22 = vadd.f32 1.0, %v3080_v8  ;;  %v1158_v8 = vld [vmem:[#allocation5 + $0x190] sm:$0xff]  ;;  %v3840_v23 = vpack.c.bf16 %v1353_v12, %v1352_v53 }
 0x389   :  { %3081 = vtanh.f32 %v3751_v17 }
 0x38a   :  { %3083 = vrcp.f32 %v996_v22  ;;  %v1162_v22 = vld [vmem:[#allocation5 + $0x1b0] sm:$0xff] }
 0x38b   :  { %v3792_v55 = vpack.c.bf16 %v1162_v22, %v1158_v8  ;;  %v3843_v8 = vpack.c.bf16 %v1355_v47, %v1354_v34  ;;  %v1356_v22 = vld [vmem:[#allocation7 + $0x70] sm:$0xff] }
 0x38c   :  { %v3847_v42 = vpack.c.bf16 %v1357_v30, %v1356_v22  ;;  %v1106_v47 = vld [vmem:[#allocation2 + $0x70] sm:$0xff]  ;;  %v1107_v22 = vld [vmem:[#allocation2 + $0x78] sm:$0xff] }
 0x393   :  { %v3082_v7 = vpop.eup %3081 }
 0x394   :  { %v3084_v24 = vpop.eup %3083 }
 0x395   :  { %v1003_v39 = vmul.f32 %v3084_v24, %v3082_v7  ;;  %v1166_v7 = vld [vmem:[#allocation5 + $0x1d0] sm:$0xff] }
 0x396   :  { %v1170_v24 = vld [vmem:[#allocation5 + $0x1f0] sm:$0xff] }
 0x397   :  { %2388 = vmatmul.mubr.f32.vlgmr.msra.gmra.mrb[8].mxu0 %v1003_v39  ;;  %1237 = vmatmul.mubr.f32.vlgmr.msra.gmra.mrb[8].mxu1 %v1003_v39  ;;  %v3798_v29 = vpack.c.bf16 %v1170_v24, %v1166_v7 }
 0x398   :  { %2794 = vmatpush1.bf16.msra.mxu0 %v3754_v27  ;;  %1307 = vmatprep.mubr.f32.mxu0 %v3329_v0 }
 0x399   :  { %2796 = vmatprep.subr.bf16.mxu0 %v3756_v60  ;;  %2422 = vmatprep.mubr.msk.f32.mxu1 %vm3331_vm0, %v3329_v0 }
 0x39c   :  { %2798 = vmatpush1.bf16.msra.mxu0 %v3759_v16 }
 0x39d   :  { %2800 = vmatprep.subr.bf16.mxu0 %v3763_v20 }
 0x3a0   :  { %2802 = vmatpush1.bf16.msra.mxu0 %v3768_v43 }
 0x3a1   :  { %2804 = vmatprep.subr.bf16.mxu0 %v3771_v25 }
 0x3a4   :  { %2806 = vmatpush1.bf16.msra.mxu0 %v3774_v1 }
 0x3a5   :  { %2808 = vmatprep.subr.bf16.mxu0 %v3777_v18 }
 0x3a8   :  { %2810 = vmatpush1.bf16.msra.mxu0 %v3780_v59 }
 0x3a9   :  { %2812 = vmatprep.subr.bf16.mxu0 %v3783_v5 }
 0x3ac   :  { %2814 = vmatpush1.bf16.msra.mxu0 %v3786_v50 }
 0x3ad   :  { %2816 = vmatprep.subr.bf16.mxu0 %v3789_v56 }
 0x3b0   :  { %2818 = vmatpush1.bf16.msra.mxu0 %v3792_v55 }
 0x3b1   :  { %2820 = vmatprep.subr.bf16.mxu0 %v3795_v58 }
 0x3b4   :  { %2822 = vmatpush1.bf16.msra.mxu0 %v3798_v29 }
 0x3b5   :  { %2848 = vmatprep.subr.bf16.mxu0 %v3694_v37 }
 0x3b7   :  { %1308 = vmatmul.mubr.f32.vlgmr.msra.gmra.mrb[10].mxu0 %v1003_v39  ;;  %v1342_v39 = vld [vmem:[#allocation7] sm:$0xff] }
 0x3b8   :  { %2850 = vmatpush1.bf16.msra.mxu0 %v3696_v52  ;;  %1574 = vmatprep.mubr.f32.mxu0 %v3329_v0  ;;  %v3820_v3 = vpack.c.bf16 %v1343_v2, %v1342_v39 }
 0x3b9   :  { %2852 = vmatprep.subr.bf16.mxu0 %v3700_v15 }
 0x3ba   :  { %2825 = vmatpush3.bf16.msra.mxu1 %v3820_v3 }
 0x3bb   :  { %2826 = vmatprep.subr.bf16.mxu1 %v4021_v54 }
 0x3bc   :  { %2854 = vmatpush1.bf16.msra.mxu0 %v3702_v32 }
 0x3bd   :  { %2856 = vmatprep.subr.bf16.mxu0 %v3706_v49 }
 0x3be   :  { %2828 = vmatpush3.bf16.msra.mxu1 %v3824_v35 }
 0x3bf   :  { %2829 = vmatprep.subr.bf16.mxu1 %v4021_v54 }
 0x3c0   :  { %2858 = vmatpush1.bf16.msra.mxu0 %v3708_v63 }
 0x3c1   :  { %2860 = vmatprep.subr.bf16.mxu0 %v3712_v19 }
 0x3c2   :  { %2831 = vmatpush3.bf16.msra.mxu1 %v3828_v33 }
 0x3c3   :  { %2832 = vmatprep.subr.bf16.mxu1 %v4021_v54 }
 0x3c4   :  { %2862 = vmatpush1.bf16.msra.mxu0 %v3714_v44 }
 0x3c5   :  { %2864 = vmatprep.subr.bf16.mxu0 %v3718_v51 }
 0x3c6   :  { %2834 = vmatpush3.bf16.msra.mxu1 %v3832_v62 }
 0x3c7   :  { %2835 = vmatprep.subr.bf16.mxu1 %v4021_v54 }
 0x3c8   :  { %2866 = vmatpush1.bf16.msra.mxu0 %v3720_v9 }
 0x3c9   :  { %2868 = vmatprep.subr.bf16.mxu0 %v3724_v26 }
 0x3ca   :  { %2837 = vmatpush3.bf16.msra.mxu1 %v3836_v41 }
 0x3cb   :  { %2838 = vmatprep.subr.bf16.mxu1 %v4021_v54 }
 0x3cc   :  { %2870 = vmatpush1.bf16.msra.mxu0 %v3726_v46 }
 0x3cd   :  { %2872 = vmatprep.subr.bf16.mxu0 %v3729_v10 }
 0x3ce   :  { %2840 = vmatpush3.bf16.msra.mxu1 %v3840_v23 }
 0x3cf   :  { %2841 = vmatprep.subr.bf16.mxu1 %v4021_v54 }
 0x3d0   :  { %2874 = vmatpush1.bf16.msra.mxu0 %v3732_v57 }
 0x3d1   :  { %2876 = vmatprep.subr.bf16.mxu0 %v3735_v61 }
 0x3d2   :  { %2843 = vmatpush3.bf16.msra.mxu1 %v3843_v8 }
 0x3d3   :  { %2844 = vmatprep.subr.bf16.mxu1 %v4021_v54 }
 0x3d4   :  { %2878 = vmatpush1.bf16.msra.mxu0 %v3740_v13 }
 0x3d5   :  { %2911 = vmatprep.subr.bf16.mxu0 %v4021_v54 }
 0x3d6   :  { %2846 = vmatpush3.bf16.msra.mxu1 %v3847_v42 }
 0x3d7   :  { %2880 = vmatprep.subr.bf16.mxu1 %v3737_v11 }
 0x46a   :  { %v1087_v7 = vpop.f32.mrb[8].mxu0  ;;  %v1238_v24 = vpop.f32.mrb[8].mxu1 }
 0x46b   :  { %v3853_v39 = vadd.f32 %v1087_v7, %v3650_v4  ;;  %v2389_v2 = vpop.f32.mrb[9].mxu0  ;;  %v1240_v6 = vpop.f32.mrb[9].mxu1  ;;  %v1314_v45 = vadd.f32 %v1238_v24, %v1104_v36 }
 0x46c   :  { %v1315_v38 = vadd.f32 %v1240_v6, %v1105_v28 }
 0x46d   :  { %1091 = vmax.xlane.f32.xlu1 %v3853_v39  ;;  %v2174_v31 = vmul.f32 -1.442695, %v1314_v45 }
 0x46e   :  { %v2175_v48 = vmul.f32 -1.442695, %v1315_v38 }
 0x470   :  { %3085 = vpow2.f32 %v2175_v48 }
 0x471   :  { %3087 = vpow2.f32 %v2174_v31 }
 0x47a   :  { %v3086_v40 = vpop.eup %3085 }
 0x47b   :  { %v3088_v53 = vpop.eup %3087  ;;  %v1327_v12 = vadd.f32 1.0, %v3086_v40 }
 0x47c   :  { %v1321_v34 = vadd.f32 1.0, %v3088_v53 }
 0x47d   :  { %3089 = vrcp.f32 %v1327_v12 }
 0x47e   :  { %3091 = vrcp.f32 %v1321_v34 }
 0x487   :  { %v3090_v24 = vpop.eup %3089 }
 0x488   :  { %v3092_v6 = vpop.eup %3091  ;;  %v1337_v36 = vmul.f32 %v3090_v24, %v3751_v17  ;;  %v1445_v17 = vld [vmem:[#allocation2 + $0x98] sm:$0xff] }
 0x48a   :  { %v1309_v4 = vpop.f32.mrb[10].mxu0 }
 0x48b   :  { %v1316_v30 = vadd.f32 %v1309_v4, %v1106_v47  ;;  %v1311_v7 = vpop.f32.mrb[11].mxu0 }
 0x48c   :  { %v1317_v2 = vadd.f32 %v1311_v7, %v1107_v22 }
 0x48d   :  { %3093 = vtanh.f32 %v1316_v30 }
 0x48e   :  { %v2176_v54 = vmul.f32 -1.442695, %v1317_v2 }
 0x490   :  { %3095 = vpow2.f32 %v2176_v54  ;;  %v4023_v54 = vmov 0.0|0.0  }
 0x497   :  { %v3094_v28 = vpop.eup %3093 }
 0x498   :  { %v1338_v38 = vmul.f32 %v3094_v28, %v3092_v6 }
 0x49a   :  { %v3096_v45 = vpop.eup %3095  ;;  %v3857_v48 = vadd.f32 %v1338_v38, %v1337_v36 }
 0x49b   :  { %v1334_v31 = vadd.f32 1.0, %v3096_v45 }
 0x49c   :  { %3097 = vtanh.f32 %v3857_v48 }
 0x49d   :  { %3099 = vrcp.f32 %v1334_v31 }
 0x4a6   :  { %v3098_v40 = vpop.eup %3097 }
 0x4a7   :  { %v3100_v53 = vpop.eup %3099 }
 0x4a8   :  { %v1341_v12 = vmul.f32 %v3100_v53, %v3098_v40 }
 0x4aa   :  { %2423 = vmatmul.mubr.f32.vlgmr.msra.gmra.mrb[10].mxu1 %v1341_v12  ;;  %1575 = vmatmul.mubr.f32.vlgmr.msra.gmra.mrb[12].mxu0 %v1341_v12 }
 0x4ab   :  { %2882 = vmatpush1.bf16.msra.mxu1 %v3754_v27  ;;  %1645 = vmatprep.mubr.f32.mxu1 %v3329_v0 }
 0x4ac   :  { %2884 = vmatprep.subr.bf16.mxu1 %v3756_v60  ;;  %2913 = vmatpush3.bf16.msra.mxu0 %v3820_v3 }
 0x4ad   :  { %2914 = vmatprep.subr.bf16.mxu0 %v4023_v54  ;;  %2457 = vmatprep.mubr.msk.f32.mxu0 %vm3331_vm0, %v3329_v0 }
 0x4af   :  { %2886 = vmatpush1.bf16.msra.mxu1 %v3759_v16 }
 0x4b0   :  { %2888 = vmatprep.subr.bf16.mxu1 %v3763_v20  ;;  %2916 = vmatpush3.bf16.msra.mxu0 %v3824_v35 }
 0x4b1   :  { %2917 = vmatprep.subr.bf16.mxu0 %v4023_v54 }
 0x4b3   :  { %2890 = vmatpush1.bf16.msra.mxu1 %v3768_v43 }
 0x4b4   :  { %2892 = vmatprep.subr.bf16.mxu1 %v3771_v25  ;;  %2919 = vmatpush3.bf16.msra.mxu0 %v3828_v33 }
 0x4b5   :  { %2920 = vmatprep.subr.bf16.mxu0 %v4023_v54 }
 0x4b7   :  { %2894 = vmatpush1.bf16.msra.mxu1 %v3774_v1 }
 0x4b8   :  { %2896 = vmatprep.subr.bf16.mxu1 %v3777_v18  ;;  %2922 = vmatpush3.bf16.msra.mxu0 %v3832_v62 }
 0x4b9   :  { %2923 = vmatprep.subr.bf16.mxu0 %v4023_v54 }
 0x4bb   :  { %2898 = vmatpush1.bf16.msra.mxu1 %v3780_v59 }
 0x4bc   :  { %2900 = vmatprep.subr.bf16.mxu1 %v3783_v5  ;;  %2925 = vmatpush3.bf16.msra.mxu0 %v3836_v41 }
 0x4bd   :  { %2926 = vmatprep.subr.bf16.mxu0 %v4023_v54 }
 0x4bf   :  { %2902 = vmatpush1.bf16.msra.mxu1 %v3786_v50 }
 0x4c0   :  { %2904 = vmatprep.subr.bf16.mxu1 %v3789_v56  ;;  %2928 = vmatpush3.bf16.msra.mxu0 %v3840_v23 }
 0x4c1   :  { %2929 = vmatprep.subr.bf16.mxu0 %v4023_v54 }
 0x4c3   :  { %2906 = vmatpush1.bf16.msra.mxu1 %v3792_v55 }
 0x4c4   :  { %2908 = vmatprep.subr.bf16.mxu1 %v3795_v58  ;;  %2931 = vmatpush3.bf16.msra.mxu0 %v3843_v8 }
 0x4c5   :  { %2932 = vmatprep.subr.bf16.mxu0 %v4023_v54 }
 0x4c7   :  { %2910 = vmatpush1.bf16.msra.mxu1 %v3798_v29 }
 0x4c8   :  { %2936 = vmatprep.subr.bf16.mxu1 %v3694_v37  ;;  %2934 = vmatpush3.bf16.msra.mxu0 %v3847_v42  ;;  %v3915_v37 = vld [vmem:[%s4015_s3] sm:$0xff]  ;;  %s3332_s3 = smov [#allocation11]  }
 0x4c9   :  { %2968 = vmatprep.subr.bf16.mxu0 %v3737_v11  ;;  %s2137_s14 = sshll.u32 %s3332_s3, 4  ;;  %s2138_s14 = int_to_ptr.vmem [resolvable:$true] %s2137_s14 }
 0x4ca   :  { %1646 = vmatmul.mubr.f32.vlgmr.msra.gmra.mrb[12].mxu1 %v1341_v12  ;;  %s3245_s15 = scalar_lea.vmem %s2138_s14, 128  ;;  %p3250_p5 = scmp.lt.s32.totalorder %s2138_s14, %s2138_s14 }
 0x4cb   :  { %2938 = vmatpush1.bf16.msra.mxu1 %v3696_v52  ;;  %1912 = vmatprep.mubr.f32.mxu1 %v3329_v0  ;;  %p3246_p4 = scmp.ne.s32.totalorder %s2138_s14, %s3245_s15  ;;  %p3251_p6 = scmp.lt.s32.totalorder %s3245_s15, %s3245_s15 }
 0x4cc   :  { %2940 = vmatprep.subr.bf16.mxu1 %v3700_v15 }
 0x4cd   :  { %p3252_p7 = por %p3251_p6, %p3250_p5 }
 0x4cf   :  { %2942 = vmatpush1.bf16.msra.mxu1 %v3702_v32  ;;  %p3253_p8 = pnand %p3252_p7, %p3246_p4 }
 0x4d0   :  { %2944 = vmatprep.subr.bf16.mxu1 %v3706_v49 }
 0x4d3   :  { %2946 = vmatpush1.bf16.msra.mxu1 %v3708_v63 }
 0x4d4   :  { %2948 = vmatprep.subr.bf16.mxu1 %v3712_v19  ;;  %v1443_v19 = vld [vmem:[#allocation2 + $0x88] sm:$0xff] }
 0x4d7   :  { %2950 = vmatpush1.bf16.msra.mxu1 %v3714_v44  ;;  %v1442_v44 = vld [vmem:[#allocation2 + $0x80] sm:$0xff] }
 0x4d8   :  { %2952 = vmatprep.subr.bf16.mxu1 %v3718_v51 }
 0x4db   :  { %2954 = vmatpush1.bf16.msra.mxu1 %v3720_v9 }
 0x4dc   :  { %2956 = vmatprep.subr.bf16.mxu1 %v3724_v26 }
 0x4df   :  { %2958 = vmatpush1.bf16.msra.mxu1 %v3726_v46 }
 0x4e0   :  { %2960 = vmatprep.subr.bf16.mxu1 %v3729_v10 }
 0x4e3   :  { %2962 = vmatpush1.bf16.msra.mxu1 %v3732_v57 }
 0x4e4   :  { %2964 = vmatprep.subr.bf16.mxu1 %v3735_v61 }
 0x4e7   :  { %2966 = vmatpush1.bf16.msra.mxu1 %v3740_v13  ;;  %v1444_v13 = vld [vmem:[#allocation2 + $0x90] sm:$0xff] }
 0x4e8   :  { %2999 = vmatprep.subr.bf16.mxu1 %v4023_v54 }
 0x57d   :  { %v1425_v52 = vpop.f32.mrb[10].mxu1  ;;  %v1576_v15 = vpop.f32.mrb[12].mxu0 }
 0x57e   :  { %v3918_v32 = vadd.f32 %v1425_v52, %v3915_v37  ;;  %v2424_v49 = vpop.f32.mrb[11].mxu1  ;;  %v1578_v63 = vpop.f32.mrb[13].mxu0  ;;  %v1652_v9 = vadd.f32 %v1576_v15, %v1442_v44 }
 0x57f   :  { %v1653_v51 = vadd.f32 %v1578_v63, %v1443_v19 }
 0x580   :  { %1429 = vmax.xlane.f32.xlu1 %v3918_v32  ;;  %v2177_v46 = vmul.f32 -1.442695, %v1652_v9 }
 0x581   :  { %v2178_v26 = vmul.f32 -1.442695, %v1653_v51 }
 0x583   :  { %3101 = vpow2.f32 %v2178_v26 }
 0x584   :  { %3103 = vpow2.f32 %v2177_v46 }
 0x58d   :  { %v3102_v10 = vpop.eup %3101 }
 0x58e   :  { %v3104_v57 = vpop.eup %3103  ;;  %v1665_v61 = vadd.f32 1.0, %v3102_v10 }
 0x58f   :  { %v1659_v11 = vadd.f32 1.0, %v3104_v57 }
 0x590   :  { %3105 = vrcp.f32 %v1665_v61 }
 0x591   :  { %3107 = vrcp.f32 %v1659_v11 }
 0x59a   :  { %v3106_v7 = vpop.eup %3105 }
 0x59b   :  { %v3108_v2 = vpop.eup %3107  ;;  %v1675_v6 = vmul.f32 %v3106_v7, %v3857_v48 }
 0x59d   :  { %v1647_v34 = vpop.f32.mrb[12].mxu1 }
 0x59e   :  { %v1654_v47 = vadd.f32 %v1647_v34, %v1444_v13  ;;  %v1649_v22 = vpop.f32.mrb[13].mxu1 }
 0x59f   :  { %v1655_v4 = vadd.f32 %v1649_v22, %v1445_v17 }
 0x5a0   :  { %3109 = vtanh.f32 %v1654_v47 }
 0x5a1   :  { %v2179_v30 = vmul.f32 -1.442695, %v1655_v4 }
 0x5a3   :  { %3111 = vpow2.f32 %v2179_v30 }
 0x5aa   :  { %v3110_v24 = vpop.eup %3109 }
 0x5ab   :  { %v1676_v28 = vmul.f32 %v3110_v24, %v3108_v2 }
 0x5ad   :  { %v3112_v36 = vpop.eup %3111  ;;  %v3922_v38 = vadd.f32 %v1676_v28, %v1675_v6 }
 0x5ae   :  { %v1672_v45 = vadd.f32 1.0, %v3112_v36 }
 0x5af   :  { %3113 = vtanh.f32 %v3922_v38 }
 0x5b0   :  { %3115 = vrcp.f32 %v1672_v45 }
 0x5b9   :  { %v3114_v31 = vpop.eup %3113 }
 0x5ba   :  { %v3116_v40 = vpop.eup %3115 }
 0x5bb   :  { %v1679_v53 = vmul.f32 %v3116_v40, %v3114_v31 }
 0x5bd   :  { %2458 = vmatmul.mubr.f32.vlgmr.msra.gmra.mrb[14].mxu0 %v1679_v53  ;;  %1913 = vmatmul.mubr.f32.vlgmr.msra.gmra.mrb[14].mxu1 %v1679_v53 }
 0x5be   :  { %2970 = vmatpush1.bf16.msra.mxu0 %v3754_v27  ;;  %1983 = vmatprep.mubr.f32.mxu0 %v3329_v0 }
 0x5bf   :  { %2972 = vmatprep.subr.bf16.mxu0 %v3756_v60  ;;  %3001 = vmatpush3.bf16.msra.mxu1 %v3820_v3  ;;  %v1092_v60 = vpop.xlane.xlu1 %1091 }
 0x5c0   :  { %3002 = vmatprep.subr.bf16.mxu1 %v4023_v54  ;;  %2492 = vmatprep.mubr.msk.f32.mxu1 %vm3331_vm0, %v3329_v0  ;;  %v417_v0 = vpop.xlane.xlu0 %416 }
 0x5c1   :  { %v3959_v27 = vsub.f32 %v3653_v14, %v417_v0 }
 0x5c2   :  { %2974 = vmatpush1.bf16.msra.mxu0 %v3759_v16 }
 0x5c3   :  { %2976 = vmatprep.subr.bf16.mxu0 %v3763_v20  ;;  %3004 = vmatpush3.bf16.msra.mxu1 %v3824_v35  ;;  %v419_v16 = vmul.f32 1.442695, %v3959_v27  ;;  %v3963_v20 = vsub.f32 %v3853_v39, %v1092_v60 }
 0x5c4   :  { %3005 = vmatprep.subr.bf16.mxu1 %v4023_v54  ;;  %v754_v61 = vpop.xlane.xlu0 %753 }
 0x5c5   :  { %3117 = vpow2.f32 %v419_v16  ;;  %v755_v28 = vsub.f32 %v3747_v21, %v754_v61 }
 0x5c6   :  { %2978 = vmatpush1.bf16.msra.mxu0 %v3768_v43  ;;  %v1094_v43 = vmul.f32 1.442695, %v3963_v20 }
 0x5c7   :  { %2980 = vmatprep.subr.bf16.mxu0 %v3771_v25  ;;  %3007 = vmatpush3.bf16.msra.mxu1 %v3828_v33 }
 0x5c8   :  { %3008 = vmatprep.subr.bf16.mxu1 %v4023_v54  ;;  %3119 = vpow2.f32 %v1094_v43 }
 0x5ca   :  { %2982 = vmatpush1.bf16.msra.mxu0 %v3774_v1 }
 0x5cb   :  { %2984 = vmatprep.subr.bf16.mxu0 %v3777_v18  ;;  %3010 = vmatpush3.bf16.msra.mxu1 %v3832_v62 }
 0x5cc   :  { %3011 = vmatprep.subr.bf16.mxu1 %v4023_v54 }
 0x5ce   :  { %2986 = vmatpush1.bf16.msra.mxu0 %v3780_v59 }
 0x5cf   :  { %2988 = vmatprep.subr.bf16.mxu0 %v3783_v5  ;;  %3013 = vmatpush3.bf16.msra.mxu1 %v3836_v41  ;;  %v3118_v14 = vpop.eup %3117 }
 0x5d0   :  { %3014 = vmatprep.subr.bf16.mxu1 %v4023_v54 }
 0x5d2   :  { %2990 = vmatpush1.bf16.msra.mxu0 %v3786_v50  ;;  %v1781_v50 = vld [vmem:[#allocation2 + $0xa8] sm:$0xff] }
 0x5d3   :  { %2992 = vmatprep.subr.bf16.mxu0 %v3789_v56  ;;  %3016 = vmatpush3.bf16.msra.mxu1 %v3840_v23  ;;  %v1780_v56 = vld [vmem:[#allocation2 + $0xa0] sm:$0xff] }
 0x5d4   :  { %3017 = vmatprep.subr.bf16.mxu1 %v4023_v54 }
 0x5d6   :  { %2994 = vmatpush1.bf16.msra.mxu0 %v3792_v55 }
 0x5d7   :  { %2996 = vmatprep.subr.bf16.mxu0 %v3795_v58  ;;  %3019 = vmatpush3.bf16.msra.mxu1 %v3843_v8  ;;  %v1782_v8 = vld [vmem:[#allocation2 + $0xb0] sm:$0xff] }
 0x5d8   :  { %3020 = vmatprep.subr.bf16.mxu1 %v4023_v54 }
 0x5da   :  { %2998 = vmatpush1.bf16.msra.mxu0 %v3798_v29  ;;  %v3120_v29 = vpop.eup %3119 }
 0x5db   :  { %3022 = vmatpush3.bf16.msra.mxu1 %v3847_v42  ;;  %v1783_v42 = vld [vmem:[#allocation2 + $0xb8] sm:$0xff] }
 0x5dd   :  { %1984 = vmatmul.mubr.f32.vlgmr.msra.gmra.mrb[16].mxu0 %v1679_v53 }
 0x60d   :  { %v1430_v36 = vpop.xlane.xlu1 %1429 }
 0x60e   :  { %v1431_v45 = vsub.f32 %v3918_v32, %v1430_v36 }
 0x610   :  { %v1432_v31 = vmul.f32 1.442695, %v1431_v45 }
 0x690   :  { %v1763_v25 = vpop.f32.mrb[14].mxu0  ;;  %v1914_v1 = vpop.f32.mrb[14].mxu1 }
 0x691   :  { %v1764_v18 = vadd.f32 %v1763_v25, %v3915_v37  ;;  %v2459_v59 = vpop.f32.mrb[15].mxu0  ;;  %v1916_v5 = vpop.f32.mrb[15].mxu1  ;;  %v1990_v58 = vadd.f32 %v1914_v1, %v1780_v56 }
 0x692   :  { %v1991_v55 = vadd.f32 %v1916_v5, %v1781_v50 }
 0x693   :  { %1767 = vmax.xlane.f32.xlu0 %v1764_v18  ;;  %v2180_v35 = vmul.f32 -1.442695, %v1990_v58 }
 0x694   :  { %v2181_v3 = vmul.f32 -1.442695, %v1991_v55 }
 0x696   :  { %3121 = vpow2.f32 %v2181_v3 }
 0x697   :  { %421 = vadd.xlane.f32.xlu0 %v3118_v14  ;;  %3123 = vpow2.f32 %v2180_v35 }
 0x69b   :  { %1096 = vadd.xlane.f32.xlu0 %v3120_v29 }
 0x6a0   :  { %v3122_v33 = vpop.eup %3121 }
 0x6a1   :  { %v3124_v62 = vpop.eup %3123  ;;  %v2003_v41 = vadd.f32 1.0, %v3122_v33 }
 0x6a2   :  { %v1997_v23 = vadd.f32 1.0, %v3124_v62 }
 0x6a3   :  { %3125 = vrcp.f32 %v2003_v41 }
 0x6a4   :  { %3127 = vrcp.f32 %v1997_v23 }
 0x6ad   :  { %v3126_v15 = vpop.eup %3125 }
 0x6ae   :  { %v3128_v49 = vpop.eup %3127  ;;  %v2013_v19 = vmul.f32 %v3126_v15, %v3922_v38  ;;  %v756_v38 = vmul.f32 1.442695, %v755_v28 }
 0x6b0   :  { %v1985_v39 = vpop.f32.mrb[16].mxu0 }
 0x6b1   :  { %v1992_v48 = vadd.f32 %v1985_v39, %v1782_v8  ;;  %v1987_v12 = vpop.f32.mrb[17].mxu0 }
 0x6b2   :  { %v1993_v54 = vadd.f32 %v1987_v12, %v1783_v42 }
 0x6b3   :  { %3129 = vtanh.f32 %v1992_v48 }
 0x6b4   :  { %v2182_v52 = vmul.f32 -1.442695, %v1993_v54 }
 0x6b6   :  { %3131 = vpow2.f32 %v2182_v52 }
 0x6bd   :  { %v3130_v63 = vpop.eup %3129 }
 0x6be   :  { %v2014_v44 = vmul.f32 %v3130_v63, %v3128_v49 }
 0x6c0   :  { %v3132_v51 = vpop.eup %3131  ;;  %v2015_v9 = vadd.f32 %v2014_v44, %v2013_v19 }
 0x6c1   :  { %v2010_v26 = vadd.f32 1.0, %v3132_v51 }
 0x6c2   :  { %3133 = vtanh.f32 %v2015_v9  ;;  %2118 = vst [vmem:[#allocation13] sm:$0xff] %v2015_v9 }
 0x6c3   :  { %3135 = vrcp.f32 %v2010_v26 }
 0x6cc   :  { %v3134_v46 = vpop.eup %3133 }
 0x6cd   :  { %v3136_v10 = vpop.eup %3135 }
 0x6ce   :  { %v2017_v57 = vmul.f32 %v3136_v10, %v3134_v46 }
 0x6d0   :  { %2493 = vmatmul.mubr.f32.vlgmr.msra.gmra.mrb[16].mxu1 %v2017_v57  ;;  %2117 = vst [vmem:[#allocation11] sm:$0xff] %v2017_v57 }
 0x720   :  { %v1768_v11 = vpop.xlane.xlu0 %1767 }
 0x721   :  { %v1769_v13 = vsub.f32 %v1764_v18, %v1768_v11 }
 0x723   :  { %v1770_v17 = vmul.f32 1.442695, %v1769_v13 }
 0x724   :  { %v422_v34 = vpop.xlane.xlu0 %421 }
 0x725   :  { %3137 = vpow2.f32 %v1770_v17 }
 0x726   :  { %3139 = vlog2.f32 %v422_v34 }
 0x728   :  { %v1097_v47 = vpop.xlane.xlu0 %1096 }
 0x729   :  { %3141 = vlog2.f32 %v1097_v47 }
 0x72a   :  { %3143 = vpow2.f32 %v756_v38 }
 0x72b   :  { %3145 = vpow2.f32 %v1432_v31 }
 0x72f   :  { %v3138_v22 = vpop.eup %3137 }
 0x730   :  { %v3140_v4 = vpop.eup %3139  ;;  %1772 = vadd.xlane.f32.xlu0 %v3138_v22 }
 0x731   :  { %v424_v30 = vmul.f32 0.6931472, %v3140_v4 }
 0x733   :  { %v3142_v7 = vpop.eup %3141  ;;  %v425_v2 = vsub.f32 %v3959_v27, %v424_v30 }
 0x734   :  { %v1099_v24 = vmul.f32 0.6931472, %v3142_v7  ;;  %v3144_v27 = vpop.eup %3143 }
 0x735   :  { %426 = vst [vmem:[#allocation10] sm:$0xff] %v425_v2  ;;  %v3146_v60 = vpop.eup %3145 }
 0x736   :  { %v1100_v6 = vsub.f32 %v3963_v20, %v1099_v24 }
 0x738   :  { %1102 = vst [vmem:[#allocation10 + $0x10] sm:$0xff] %v1100_v6 }
 0x7a3   :  { %v2101_v40 = vpop.f32.mrb[16].mxu1 }
 0x7a4   :  { %v2102_v53 = vadd.f32 %v2101_v40, %v3915_v37  ;;  %v2494_v0 = vpop.f32.mrb[17].mxu1 }
 0x7a6   :  { %2105 = vmax.xlane.f32.xlu1 %v2102_v53 }
 0x7aa   :  { %758 = vadd.xlane.f32.xlu1 %v3144_v27 }
 0x7ae   :  { %1434 = vadd.xlane.f32.xlu1 %v3146_v60 }
 0x7bd   :  { %v1773_v16 = vpop.xlane.xlu0 %1772 }
 0x7be   :  { %3147 = vlog2.f32 %v1773_v16 }
 0x7c8   :  { %v3148_v20 = vpop.eup %3147 }
 0x7c9   :  { %v1775_v21 = vmul.f32 0.6931472, %v3148_v20 }
 0x7cb   :  { %v1776_v43 = vsub.f32 %v1769_v13, %v1775_v21 }
 0x7cd   :  { %1778 = vst [vmem:[#allocation10 + $0x20] sm:$0xff] %v1776_v43 }
 0x833   :  { %v2106_v25 = vpop.xlane.xlu1 %2105 }
 0x834   :  { %v2107_v32 = vsub.f32 %v2102_v53, %v2106_v25 }
 0x836   :  { %v2108_v1 = vmul.f32 1.442695, %v2107_v32 }
 0x837   :  { %v759_v18 = vpop.xlane.xlu1 %758 }
 0x838   :  { %3149 = vpow2.f32 %v2108_v1 }
 0x839   :  { %3151 = vlog2.f32 %v759_v18 }
 0x83b   :  { %v1435_v59 = vpop.xlane.xlu1 %1434 }
 0x83c   :  { %3153 = vlog2.f32 %v1435_v59 }
 0x842   :  { %v3150_v37 = vpop.eup %3149 }
 0x843   :  { %v3152_v5 = vpop.eup %3151  ;;  %2110 = vadd.xlane.f32.xlu1 %v3150_v37 }
 0x844   :  { %v761_v50 = vmul.f32 0.6931472, %v3152_v5 }
 0x846   :  { %v3154_v14 = vpop.eup %3153  ;;  %v762_v56 = vsub.f32 %v755_v28, %v761_v50 }
 0x847   :  { %v1437_v55 = vmul.f32 0.6931472, %v3154_v14 }
 0x848   :  { %764 = vst [vmem:[#allocation10 + $0x8] sm:$0xff] %v762_v56 }
 0x849   :  { %v1438_v58 = vsub.f32 %v1431_v45, %v1437_v55 }
 0x84b   :  { %1440 = vst [vmem:[#allocation10 + $0x18] sm:$0xff] %v1438_v58 }
 0x84c   :  { %3256 = shalt.err (!%p3253_p8)
}
 0x84d   :  { %s3257_s20 = scalar_lea.hbm %s4019_s7, 128 }
 0x84e   :  { %p3258_p9 = scmp.ne.s32.totalorder %s4019_s7, %s3257_s20  ;;  %p3261_p10 = scmp.lt.u32.totalorder %s3257_s20, %s4019_s7 }
 0x850   :  { %p3263_p11 = pnand %p3261_p10, %p3258_p9 }
 0x852   :  { %3266 = shalt.err (!%p3263_p11)
}
 0x853   :  { %2140 = dma.vmem_to_hbm [thread:$0]  %s2138_s14, 128, %s4019_s7, [#allocation12]  }
 0x854   :  { %s3333_s25 = smov [#allocation13]  }
 0x855   :  { %s2147_s26 = sshll.u32 %s3333_s25, 4  ;;  %s2148_s26 = int_to_ptr.vmem [resolvable:$true] %s2147_s26 }
 0x856   :  { %s3267_s27 = scalar_lea.vmem %s2148_s26, 128  ;;  %p3272_p13 = scmp.lt.s32.totalorder %s2148_s26, %s2148_s26 }
 0x857   :  { %p3268_p12 = scmp.ne.s32.totalorder %s2148_s26, %s3267_s27  ;;  %p3273_p0 = scmp.lt.s32.totalorder %s3267_s27, %s3267_s27 }
 0x859   :  { %p3274_p1 = por %p3273_p0, %p3272_p13 }
 0x85b   :  { %p3275_p2 = pnand %p3274_p1, %p3268_p12 }
 0x85d   :  { %3278 = shalt.err (!%p3275_p2)
}
 0x85e   :  { %s3279_s28 = scalar_lea.hbm %s4020_s8, 128 }
 0x85f   :  { %p3280_p3 = scmp.ne.s32.totalorder %s4020_s8, %s3279_s28  ;;  %p3283_p4 = scmp.lt.u32.totalorder %s3279_s28, %s4020_s8 }
 0x861   :  { %p3285_p5 = pnand %p3283_p4, %p3280_p3 }
 0x863   :  { %3288 = shalt.err (!%p3285_p5)
}
 0x864   :  { %2150 = dma.vmem_to_hbm [thread:$0]  %s2148_s26, 128, %s4020_s8, [#allocation12]  }
 0x865   :  { %s3334_s11 = smov [#allocation10]  }
 0x866   :  { %s2124_s12 = sshll.u32 %s3334_s11, 4  ;;  %s2125_s12 = int_to_ptr.vmem [resolvable:$true] %s2124_s12 }
 0x867   :  { %s3289_s13 = scalar_lea.vmem %s2125_s12, 768  ;;  %p3294_p7 = scmp.lt.s32.totalorder %s2125_s12, %s2125_s12 }
 0x868   :  { %p3290_p6 = scmp.ne.s32.totalorder %s2125_s12, %s3289_s13  ;;  %p3295_p8 = scmp.lt.s32.totalorder %s3289_s13, %s3289_s13 }
 0x86a   :  { %p3296_p9 = por %p3295_p8, %p3294_p7 }
 0x86c   :  { %p3297_p10 = pnand %p3296_p9, %p3290_p6 }
 0x8d0   :  { %v2111_v29 = vpop.xlane.xlu1 %2110 }
 0x8d1   :  { %3155 = vlog2.f32 %v2111_v29 }
 0x8db   :  { %v3156_v3 = vpop.eup %3155 }
 0x8dc   :  { %v2113_v35 = vmul.f32 0.6931472, %v3156_v3 }
 0x8de   :  { %v2114_v33 = vsub.f32 %v2107_v32, %v2113_v35 }
 0x8e0   :  { %2116 = vst [vmem:[#allocation10 + $0x28] sm:$0xff] %v2114_v33 }
 0x8e1   :  { %3300 = shalt.err (!%p3297_p10)
}
 0x8e2   :  { %s3301_s8 = scalar_lea.hbm %s4018_s6, 768 }
 0x8e3   :  { %p3302_p11 = scmp.ne.s32.totalorder %s4018_s6, %s3301_s8  ;;  %p3305_p12 = scmp.lt.u32.totalorder %s3301_s8, %s4018_s6 }
 0x8e5   :  { %p3307_p13 = pnand %p3305_p12, %p3302_p11 }
 0x8e7   :  { %3310 = shalt.err (!%p3307_p13)
}
 0x8e8   :  { %2130 = dma.vmem_to_hbm [thread:$0]  %s2125_s12, 768, %s4018_s6, [#allocation4], %s3326_s0, %s3326_s0, %s3327_s30  }
 0x8e9   :  { %3317 = dma.done.wait [#allocation4], 768  }
 0x8ea   :  { %3318 = vsyncadd [#allocation4], 4294966528 }
 0x8eb   :  { %3319 = dma.done.wait [#allocation12], 256  }
 0x8ec   :  { %3320 = vsyncadd [#allocation12], 4294967040 }
 0x8ed   :  { %2160 = vsyncpa [#allocation3], 1 }
 0x8ee   :  { %2161 = vsyncpa [#allocation6], 1 }
 0x8ef   :  { %2162 = vsyncpa [#allocation9], 1 }
 0x8f0   :  { %2163 = vsyncpa [#allocation4], 1 }
 0x8f1   :  { %2164 = vsyncpa [#allocation12], 1 }

</bundles_post_ra>
